<compile_context>
chip_gen: v7x
topology: tpu7x:2x2x1
jax: 0.10.0
libtpu: 0.0.40
codegen_flags: <defaults>
</compile_context>

<pallas_src>
import functools

import jax
import jax.numpy as jnp
from jax.experimental import pallas as pl
from jax.experimental.pallas import tpu as pltpu


def _round_up(x, m):
    return (x + m - 1) // m * m


def _lstm_recurrence_kernel(lens_ref, gx_ref, whh_ref, h_ref, c_ref, *, tc):
    """One grid step == one chunk of `tc` timesteps.

    Shapes (padded by the wrapper):
      lens_ref : (Bp, 1)        int32
      gx_ref   : (tc*Bp, 4*Hp)  bf16   precomputed X@W_ih^T + b for this chunk
      whh_ref  : (Hp, 4*Hp)     bf16   gate-blocked, lane-padded W_hh^T (resident)
      h_ref    : (Bp, Hp)       f32    output ref == resident hidden state
      c_ref    : (Bp, Hp)       f32    scratch cell state (persists across chunks)
    """
    Bp, Hp = h_ref.shape

    @pl.when(pl.program_id(0) == 0)
    def _():
        h_ref[...] = jnp.zeros_like(h_ref)
        c_ref[...] = jnp.zeros_like(c_ref)

    lens = lens_ref[...]                      # (Bp, 1) int32
    t0 = pl.program_id(0) * tc                # first global timestep of this chunk

    def step(j, carry):
        h, c = carry                          # (Bp, Hp) f32 vreg-resident state

        row = j * Bp
        if not isinstance(row, int):          # alignment hint for dynamic slice
            row = pl.multiple_of(row, Bp)
        gx_t = gx_ref[pl.ds(row, Bp), :].astype(jnp.float32)   # (Bp, 4Hp)

        gates = gx_t + jnp.dot(
            h.astype(jnp.bfloat16), whh_ref[...],
            preferred_element_type=jnp.float32)

        # Each gate slice is a full, lane-aligned Hp-wide block (Hp % 128 == 0).
        z_i = gates[:, 0 * Hp:1 * Hp]
        z_f = gates[:, 1 * Hp:2 * Hp]
        z_g = gates[:, 2 * Hp:3 * Hp]
        z_o = gates[:, 3 * Hp:4 * Hp]

        # sigmoid(x) == 0.5*tanh(0.5*x) + 0.5  -> single EUP pass per gate.
        i_g = 0.5 * jnp.tanh(0.5 * z_i) + 0.5
        f_g = 0.5 * jnp.tanh(0.5 * z_f) + 0.5
        g_g = jnp.tanh(z_g)
        o_g = 0.5 * jnp.tanh(0.5 * z_o) + 0.5

        c_new = f_g * c + i_g * g_g
        h_new = o_g * jnp.tanh(c_new)

        upd = (t0 + j) < lens                 # (Bp, 1) bool
        return jnp.where(upd, h_new, h), jnp.where(upd, c_new, c)

    h, c = jax.lax.fori_loop(
        0, tc, step, (h_ref[...], c_ref[...]),
        unroll=max(1, min(8, tc)))

    h_ref[...] = h
    c_ref[...] = c


def lstm_encoder_pallas(sent, sent_len, w_ih, w_hh, b_ih, b_hh):
    """sent: (B, T, E) batch-first; sent_len: (B,) int; PyTorch LSTM weights
       w_ih: (4H, E), w_hh: (4H, H), b_ih/b_hh: (4H,), gate order [i, f, g, o].
       Returns (B, H) == h_n.squeeze(0) of a 1-layer LSTM over packed sequences."""
    B, T, E = sent.shape
    H = w_hh.shape[1]
    Bp = _round_up(max(B, 8), 8)        # sublane-aligned batch
    Hp = _round_up(max(H, 128), 128)    # lane-aligned hidden / gate blocks

    # ---- weight / bias layout: gate-blocked, lane-padded ---------------------
    wih4 = jnp.pad(w_ih.astype(jnp.float32).reshape(4, H, E),
                   ((0, 0), (0, Hp - H), (0, 0)))                  # (4, Hp, E)
    wih_t = jnp.transpose(wih4, (2, 0, 1)).reshape(E, 4 * Hp)      # (E, 4Hp)

    whh4 = jnp.pad(w_hh.astype(jnp.float32).reshape(4, H, H),
                   ((0, 0), (0, Hp - H), (0, Hp - H)))             # (4, Hp, Hp)
    whh_t = (jnp.transpose(whh4, (2, 0, 1))
             .reshape(Hp, 4 * Hp).astype(jnp.bfloat16))            # (Hp, 4Hp)

    bias = jnp.pad((b_ih + b_hh).astype(jnp.float32).reshape(4, H),
                   ((0, 0), (0, Hp - H))).reshape(1, 4 * Hp)       # (1, 4Hp) f32

    # ---- Phase 1 (plain XLA, off the serial path): input projections --------
    x = jnp.transpose(sent, (1, 0, 2)).astype(jnp.float32)         # (T, B, E)
    x = jnp.pad(x, ((0, 0), (0, Bp - B), (0, 0)))                  # (T, Bp, E)
    gx = jnp.einsum("tbe,eg->tbg",
                    x.astype(jnp.bfloat16), wih_t.astype(jnp.bfloat16),
                    preferred_element_type=jnp.float32) + bias     # (T, Bp, 4Hp) f32

    # ---- chunking: keep the per-chunk bf16 gx block well under VMEM ---------
    per_step_bytes = Bp * 4 * Hp * 2                               # bf16
    gx_budget = 12 * 1024 * 1024                                   # per buffer; 2x-buffered
    tc = int(max(1, min(T, gx_budget // per_step_bytes, 256)))
    n_chunks = -(-T // tc)
    Tp = n_chunks * tc
    gx = jnp.pad(gx, ((0, Tp - T), (0, 0), (0, 0)))                # padded steps masked out
    gx = gx.reshape(Tp * Bp, 4 * Hp).astype(jnp.bfloat16)          # (Tp*Bp, 4Hp) bf16

    lens = jnp.pad(sent_len.astype(jnp.int32), (0, Bp - B)).reshape(Bp, 1)

    # ---- VMEM limit from actual buffer sizes (+ headroom), capped for v7x ---
    vmem_bytes = (2 * (tc * Bp * 4 * Hp * 2        # gx chunk (double-buffered, bf16)
                       + Hp * 4 * Hp * 2           # W_hh^T
                       + 8 * 128 * 4)              # lens (tile-padded)
                  + Bp * Hp * 4                    # resident h output
                  + Bp * Hp * 4)                   # c scratch
    vmem_limit = min(int(vmem_bytes * 1.5) + (4 << 20), 64 << 20)

    grid_spec = pltpu.PrefetchScalarGridSpec(
        num_scalar_prefetch=0,
        grid=(n_chunks,),
        in_specs=[
            pl.BlockSpec((Bp, 1), lambda i: (0, 0)),               # lens (resident)
            pl.BlockSpec((tc * Bp, 4 * Hp), lambda i: (i, 0)),     # gx chunk (streamed)
            pl.BlockSpec((Hp, 4 * Hp), lambda i: (0, 0)),          # W_hh^T (resident)
        ],
        out_specs=pl.BlockSpec((Bp, Hp), lambda i: (0, 0)),        # h state / output
        scratch_shapes=[
            pltpu.VMEM((Bp, Hp), jnp.float32),                     # cell state
        ],
    )

    out = pl.pallas_call(
        functools.partial(_lstm_recurrence_kernel, tc=tc),
        out_shape=jax.ShapeDtypeStruct((Bp, Hp), jnp.float32),
        grid_spec=grid_spec,
        compiler_params=pltpu.CompilerParams(
            dimension_semantics=("arbitrary",),
            vmem_limit_bytes=vmem_limit,
        ),
    )(lens, gx, whh_t)

    return out[:B, :H]


def lstm_encoder_ref(sent, sent_len, w_ih, w_hh, b_ih, b_hh):
    """Pure-JAX f32 reference (packed-LSTM semantics) for verification."""
    B, T, E = sent.shape
    H = w_hh.shape[1]
    x_tme = jnp.transpose(sent, (1, 0, 2)).astype(jnp.float32)
    wih_t, whh_t = w_ih.T, w_hh.T
    bias = b_ih + b_hh

    def step(carry, inp):
        h, c = carry
        x_t, t = inp
        gates = x_t @ wih_t + h @ whh_t + bias
        i = jax.nn.sigmoid(gates[:, :H])
        f = jax.nn.sigmoid(gates[:, H:2 * H])
        g = jnp.tanh(gates[:, 2 * H:3 * H])
        o = jax.nn.sigmoid(gates[:, 3 * H:])
        c_new = f * c + i * g
        h_new = o * jnp.tanh(c_new)
        m = (t < sent_len)[:, None]
        return (jnp.where(m, h_new, h), jnp.where(m, c_new, c)), None

    init = (jnp.zeros((B, H), jnp.float32), jnp.zeros((B, H), jnp.float32))
    (h, _), _ = jax.lax.scan(step, init, (x_tme, jnp.arange(T)))
    return h


if __name__ == "__main__":
    # Module config: word_embed_dim=16, enc_n_layers=1, enc_h_dim=32.
    B, T, E, H = 4, 8, 16, 32

    key = jax.random.PRNGKey(0)
    k_sent, k_wih, k_whh, k_bih, k_bhh = jax.random.split(key, 5)

    sent = jax.random.normal(k_sent, (B, T, E), dtype=jnp.float32)
    sent_len = jnp.array([8, 5, 3, 6], dtype=jnp.int32)

    # PyTorch LSTM default init: U(-1/sqrt(H), 1/sqrt(H)), gate order [i, f, g, o].
    bound = 1.0 / jnp.sqrt(jnp.float32(H))
    w_ih = jax.random.uniform(k_wih, (4 * H, E), minval=-bound, maxval=bound)
    w_hh = jax.random.uniform(k_whh, (4 * H, H), minval=-bound, maxval=bound)
    b_ih = jax.random.uniform(k_bih, (4 * H,), minval=-bound, maxval=bound)
    b_hh = jax.random.uniform(k_bhh, (4 * H,), minval=-bound, maxval=bound)

    run = jax.jit(lstm_encoder_pallas)
    h_n = jax.block_until_ready(run(sent, sent_len, w_ih, w_hh, b_ih, b_hh))

    h_ref = lstm_encoder_ref(sent, sent_len, w_ih, w_hh, b_ih, b_hh)
    assert h_n.shape == (B, H)
    # bf16 matmul operands + bf16-streamed gx vs f32 reference -> loose tolerance.
    err = jnp.max(jnp.abs(h_n - h_ref))
    assert jnp.allclose(h_n, h_ref, atol=3e-2, rtol=3e-2), (
        f"mismatch vs reference (max |err|={err})")

    print("KERNEL_OK")
</pallas_src>

<mosaic_0001>
module attributes {stable_mosaic.version = 11 : i64} {
  func.func @_lstm_recurrence_kernel(%arg0: i32, %arg1: memref<8x1xi32, #tpu.memory_space<vmem>>, %arg2: memref<64x512xbf16, #tpu.memory_space<vmem>>, %arg3: memref<128x512xbf16, #tpu.memory_space<vmem>>, %arg4: memref<8x128xf32, #tpu.memory_space<vmem>>, %arg5: memref<8x128xf32, #tpu.memory_space<vmem>>) attributes {dimension_semantics = [#tpu.dimension_semantics<arbitrary>], iteration_bounds = array<i64: 1>, scalar_prefetch = 0 : i64, scratch_operands = 1 : i64, tpu.core_type = #tpu.core_type<tc>, window_params = [{pipeline_mode = #tpu.pipeline_mode<synchronous>, transform_indices = @transform_0, window_bounds = array<i64: 8, 1>}, {transform_indices = @transform_1, window_bounds = array<i64: 64, 512>}, {pipeline_mode = #tpu.pipeline_mode<synchronous>, transform_indices = @transform_2, window_bounds = array<i64: 128, 512>}, {pipeline_mode = #tpu.pipeline_mode<synchronous>, transform_indices = @transform_3, window_bounds = array<i64: 8, 128>}]} {
    %c0_i32 = arith.constant 0 : i32
    %0 = arith.cmpi eq, %arg0, %c0_i32 : i32
    %1 = arith.extui %0 : i1 to i32
    %c0_i32_0 = arith.constant 0 : i32
    %2 = arith.cmpi ne, %1, %c0_i32_0 : i32
    scf.if %2 {
      %cst_123 = arith.constant 0.000000e+00 : f32
      %401 = vector.broadcast %cst_123 : f32 to vector<8x128xf32>
      %c0_124 = arith.constant 0 : index
      %c0_125 = arith.constant 0 : index
      %402 = vector.load %arg4[%c0_124, %c0_125] : memref<8x128xf32, #tpu.memory_space<vmem>>, vector<8x128xf32>
      tpu.vector_store %arg4[%c0_124, %c0_125], %401 {strides = array<i32>} : memref<8x128xf32, #tpu.memory_space<vmem>>, vector<8x128xf32>,
      %cst_126 = arith.constant 0.000000e+00 : f32
      %403 = vector.broadcast %cst_126 : f32 to vector<8x128xf32>
      %c0_127 = arith.constant 0 : index
      %c0_128 = arith.constant 0 : index
      %404 = vector.load %arg5[%c0_127, %c0_128] : memref<8x128xf32, #tpu.memory_space<vmem>>, vector<8x128xf32>
      tpu.vector_store %arg5[%c0_127, %c0_128], %403 {strides = array<i32>} : memref<8x128xf32, #tpu.memory_space<vmem>>, vector<8x128xf32>,
    } else {
    }
    %c0 = arith.constant 0 : index
    %c0_1 = arith.constant 0 : index
    %3 = vector.load %arg1[%c0, %c0_1] : memref<8x1xi32, #tpu.memory_space<vmem>>, vector<8x1xi32>
    %c8_i32 = arith.constant 8 : i32
    %4 = arith.muli %arg0, %c8_i32 : i32
    %c0_2 = arith.constant 0 : index
    %c0_3 = arith.constant 0 : index
    %5 = vector.load %arg4[%c0_2, %c0_3] : memref<8x128xf32, #tpu.memory_space<vmem>>, vector<8x128xf32>
    %c0_4 = arith.constant 0 : index
    %c0_5 = arith.constant 0 : index
    %6 = vector.load %arg5[%c0_4, %c0_5] : memref<8x128xf32, #tpu.memory_space<vmem>>, vector<8x128xf32>
    %c0_i32_6 = arith.constant 0 : i32
    %c8_i32_7 = arith.constant 8 : i32
    %7 = arith.muli %c0_i32_6, %c8_i32_7 : i32
    %8 = tpu.assume_multiple %7, 8 : i32
    %9 = arith.index_cast %8 : i32 to index
    %c0_8 = arith.constant 0 : index
    %10 = vector.load %arg2[%9, %c0_8] : memref<64x512xbf16, #tpu.memory_space<vmem>>, vector<8x512xbf16>
    %11 = arith.extf %10 : vector<8x512xbf16> to vector<8x512xf32>
    %12 = arith.truncf %5 : vector<8x128xf32> to vector<8x128xbf16>
    %c0_9 = arith.constant 0 : index
    %c0_10 = arith.constant 0 : index
    %13 = vector.load %arg3[%c0_9, %c0_10] : memref<128x512xbf16, #tpu.memory_space<vmem>>, vector<128x512xbf16>
    %cst = arith.constant dense<0.000000e+00> : vector<8x512xf32>
    %14 = tpu.matmul %12, %13, %cst {dimension_numbers = #tpu.dot_dimension_numbers<[1], [0], [0], [1], [0, 0, 1, 1], [], []>} : vector<8x128xbf16>, vector<128x512xbf16>, vector<8x512xf32> -> vector<8x512xf32>
    %15 = arith.addf %11, %14 : vector<8x512xf32>
    %16 = vector.extract_strided_slice %15 {offsets = [0, 0], sizes = [8, 128], strides = [1, 1]} : vector<8x512xf32> to vector<8x128xf32>
    %17 = vector.extract_strided_slice %15 {offsets = [0, 128], sizes = [8, 128], strides = [1, 1]} : vector<8x512xf32> to vector<8x128xf32>
    %18 = vector.extract_strided_slice %15 {offsets = [0, 256], sizes = [8, 128], strides = [1, 1]} : vector<8x512xf32> to vector<8x128xf32>
    %19 = vector.extract_strided_slice %15 {offsets = [0, 384], sizes = [8, 128], strides = [1, 1]} : vector<8x512xf32> to vector<8x128xf32>
    %cst_11 = arith.constant 5.000000e-01 : f32
    %20 = vector.broadcast %cst_11 : f32 to vector<8x128xf32>
    %21 = arith.mulf %20, %16 : vector<8x128xf32>
    %22 = math.tanh %21 : vector<8x128xf32>
    %cst_12 = arith.constant 5.000000e-01 : f32
    %23 = vector.broadcast %cst_12 : f32 to vector<8x128xf32>
    %24 = arith.mulf %23, %22 : vector<8x128xf32>
    %cst_13 = arith.constant 5.000000e-01 : f32
    %25 = vector.broadcast %cst_13 : f32 to vector<8x128xf32>
    %26 = arith.addf %24, %25 : vector<8x128xf32>
    %cst_14 = arith.constant 5.000000e-01 : f32
    %27 = vector.broadcast %cst_14 : f32 to vector<8x128xf32>
    %28 = arith.mulf %27, %17 : vector<8x128xf32>
    %29 = math.tanh %28 : vector<8x128xf32>
    %cst_15 = arith.constant 5.000000e-01 : f32
    %30 = vector.broadcast %cst_15 : f32 to vector<8x128xf32>
    %31 = arith.mulf %30, %29 : vector<8x128xf32>
    %cst_16 = arith.constant 5.000000e-01 : f32
    %32 = vector.broadcast %cst_16 : f32 to vector<8x128xf32>
    %33 = arith.addf %31, %32 : vector<8x128xf32>
    %34 = math.tanh %18 : vector<8x128xf32>
    %cst_17 = arith.constant 5.000000e-01 : f32
    %35 = vector.broadcast %cst_17 : f32 to vector<8x128xf32>
    %36 = arith.mulf %35, %19 : vector<8x128xf32>
    %37 = math.tanh %36 : vector<8x128xf32>
    %cst_18 = arith.constant 5.000000e-01 : f32
    %38 = vector.broadcast %cst_18 : f32 to vector<8x128xf32>
    %39 = arith.mulf %38, %37 : vector<8x128xf32>
    %cst_19 = arith.constant 5.000000e-01 : f32
    %40 = vector.broadcast %cst_19 : f32 to vector<8x128xf32>
    %41 = arith.addf %39, %40 : vector<8x128xf32>
    %42 = arith.mulf %33, %6 : vector<8x128xf32>
    %43 = arith.mulf %26, %34 : vector<8x128xf32>
    %44 = arith.addf %42, %43 : vector<8x128xf32>
    %45 = math.tanh %44 : vector<8x128xf32>
    %46 = arith.mulf %41, %45 : vector<8x128xf32>
    %47 = arith.addi %4, %c0_i32_6 : i32
    %48 = vector.broadcast %47 : i32 to vector<8x1xi32>
    %49 = arith.cmpi slt, %48, %3 : vector<8x1xi32>
    %50 = vector.shape_cast %49 : vector<8x1xi1> to vector<8x1xi1>
    %51 = vector.broadcast %50 : vector<8x1xi1> to vector<8x128xi1>
    %52 = arith.select %51, %46, %5 : vector<8x128xi1>, vector<8x128xf32>
    %53 = vector.shape_cast %49 : vector<8x1xi1> to vector<8x1xi1>
    %54 = vector.broadcast %53 : vector<8x1xi1> to vector<8x128xi1>
    %55 = arith.select %54, %44, %6 : vector<8x128xi1>, vector<8x128xf32>
    %c1_i32 = arith.constant 1 : i32
    %c8_i32_20 = arith.constant 8 : i32
    %56 = arith.muli %c1_i32, %c8_i32_20 : i32
    %57 = tpu.assume_multiple %56, 8 : i32
    %58 = arith.index_cast %57 : i32 to index
    %c0_21 = arith.constant 0 : index
    %59 = vector.load %arg2[%58, %c0_21] : memref<64x512xbf16, #tpu.memory_space<vmem>>, vector<8x512xbf16>
    %60 = arith.extf %59 : vector<8x512xbf16> to vector<8x512xf32>
    %61 = arith.truncf %52 : vector<8x128xf32> to vector<8x128xbf16>
    %c0_22 = arith.constant 0 : index
    %c0_23 = arith.constant 0 : index
    %62 = vector.load %arg3[%c0_22, %c0_23] : memref<128x512xbf16, #tpu.memory_space<vmem>>, vector<128x512xbf16>
    %cst_24 = arith.constant dense<0.000000e+00> : vector<8x512xf32>
    %63 = tpu.matmul %61, %62, %cst_24 {dimension_numbers = #tpu.dot_dimension_numbers<[1], [0], [0], [1], [0, 0, 1, 1], [], []>} : vector<8x128xbf16>, vector<128x512xbf16>, vector<8x512xf32> -> vector<8x512xf32>
    %64 = arith.addf %60, %63 : vector<8x512xf32>
    %65 = vector.extract_strided_slice %64 {offsets = [0, 0], sizes = [8, 128], strides = [1, 1]} : vector<8x512xf32> to vector<8x128xf32>
    %66 = vector.extract_strided_slice %64 {offsets = [0, 128], sizes = [8, 128], strides = [1, 1]} : vector<8x512xf32> to vector<8x128xf32>
    %67 = vector.extract_strided_slice %64 {offsets = [0, 256], sizes = [8, 128], strides = [1, 1]} : vector<8x512xf32> to vector<8x128xf32>
    %68 = vector.extract_strided_slice %64 {offsets = [0, 384], sizes = [8, 128], strides = [1, 1]} : vector<8x512xf32> to vector<8x128xf32>
    %cst_25 = arith.constant 5.000000e-01 : f32
    %69 = vector.broadcast %cst_25 : f32 to vector<8x128xf32>
    %70 = arith.mulf %69, %65 : vector<8x128xf32>
    %71 = math.tanh %70 : vector<8x128xf32>
    %cst_26 = arith.constant 5.000000e-01 : f32
    %72 = vector.broadcast %cst_26 : f32 to vector<8x128xf32>
    %73 = arith.mulf %72, %71 : vector<8x128xf32>
    %cst_27 = arith.constant 5.000000e-01 : f32
    %74 = vector.broadcast %cst_27 : f32 to vector<8x128xf32>
    %75 = arith.addf %73, %74 : vector<8x128xf32>
    %cst_28 = arith.constant 5.000000e-01 : f32
    %76 = vector.broadcast %cst_28 : f32 to vector<8x128xf32>
    %77 = arith.mulf %76, %66 : vector<8x128xf32>
    %78 = math.tanh %77 : vector<8x128xf32>
    %cst_29 = arith.constant 5.000000e-01 : f32
    %79 = vector.broadcast %cst_29 : f32 to vector<8x128xf32>
    %80 = arith.mulf %79, %78 : vector<8x128xf32>
    %cst_30 = arith.constant 5.000000e-01 : f32
    %81 = vector.broadcast %cst_30 : f32 to vector<8x128xf32>
    %82 = arith.addf %80, %81 : vector<8x128xf32>
    %83 = math.tanh %67 : vector<8x128xf32>
    %cst_31 = arith.constant 5.000000e-01 : f32
    %84 = vector.broadcast %cst_31 : f32 to vector<8x128xf32>
    %85 = arith.mulf %84, %68 : vector<8x128xf32>
    %86 = math.tanh %85 : vector<8x128xf32>
    %cst_32 = arith.constant 5.000000e-01 : f32
    %87 = vector.broadcast %cst_32 : f32 to vector<8x128xf32>
    %88 = arith.mulf %87, %86 : vector<8x128xf32>
    %cst_33 = arith.constant 5.000000e-01 : f32
    %89 = vector.broadcast %cst_33 : f32 to vector<8x128xf32>
    %90 = arith.addf %88, %89 : vector<8x128xf32>
    %91 = arith.mulf %82, %55 : vector<8x128xf32>
    %92 = arith.mulf %75, %83 : vector<8x128xf32>
    %93 = arith.addf %91, %92 : vector<8x128xf32>
    %94 = math.tanh %93 : vector<8x128xf32>
    %95 = arith.mulf %90, %94 : vector<8x128xf32>
    %96 = arith.addi %4, %c1_i32 : i32
    %97 = vector.broadcast %96 : i32 to vector<8x1xi32>
    %98 = arith.cmpi slt, %97, %3 : vector<8x1xi32>
    %99 = vector.shape_cast %98 : vector<8x1xi1> to vector<8x1xi1>
    %100 = vector.broadcast %99 : vector<8x1xi1> to vector<8x128xi1>
    %101 = arith.select %100, %95, %52 : vector<8x128xi1>, vector<8x128xf32>
    %102 = vector.shape_cast %98 : vector<8x1xi1> to vector<8x1xi1>
    %103 = vector.broadcast %102 : vector<8x1xi1> to vector<8x128xi1>
    %104 = arith.select %103, %93, %55 : vector<8x128xi1>, vector<8x128xf32>
    %c2_i32 = arith.constant 2 : i32
    %c8_i32_34 = arith.constant 8 : i32
    %105 = arith.muli %c2_i32, %c8_i32_34 : i32
    %106 = tpu.assume_multiple %105, 8 : i32
    %107 = arith.index_cast %106 : i32 to index
    %c0_35 = arith.constant 0 : index
    %108 = vector.load %arg2[%107, %c0_35] : memref<64x512xbf16, #tpu.memory_space<vmem>>, vector<8x512xbf16>
    %109 = arith.extf %108 : vector<8x512xbf16> to vector<8x512xf32>
    %110 = arith.truncf %101 : vector<8x128xf32> to vector<8x128xbf16>
    %c0_36 = arith.constant 0 : index
    %c0_37 = arith.constant 0 : index
    %111 = vector.load %arg3[%c0_36, %c0_37] : memref<128x512xbf16, #tpu.memory_space<vmem>>, vector<128x512xbf16>
    %cst_38 = arith.constant dense<0.000000e+00> : vector<8x512xf32>
    %112 = tpu.matmul %110, %111, %cst_38 {dimension_numbers = #tpu.dot_dimension_numbers<[1], [0], [0], [1], [0, 0, 1, 1], [], []>} : vector<8x128xbf16>, vector<128x512xbf16>, vector<8x512xf32> -> vector<8x512xf32>
    %113 = arith.addf %109, %112 : vector<8x512xf32>
    %114 = vector.extract_strided_slice %113 {offsets = [0, 0], sizes = [8, 128], strides = [1, 1]} : vector<8x512xf32> to vector<8x128xf32>
    %115 = vector.extract_strided_slice %113 {offsets = [0, 128], sizes = [8, 128], strides = [1, 1]} : vector<8x512xf32> to vector<8x128xf32>
    %116 = vector.extract_strided_slice %113 {offsets = [0, 256], sizes = [8, 128], strides = [1, 1]} : vector<8x512xf32> to vector<8x128xf32>
    %117 = vector.extract_strided_slice %113 {offsets = [0, 384], sizes = [8, 128], strides = [1, 1]} : vector<8x512xf32> to vector<8x128xf32>
    %cst_39 = arith.constant 5.000000e-01 : f32
    %118 = vector.broadcast %cst_39 : f32 to vector<8x128xf32>
    %119 = arith.mulf %118, %114 : vector<8x128xf32>
    %120 = math.tanh %119 : vector<8x128xf32>
    %cst_40 = arith.constant 5.000000e-01 : f32
    %121 = vector.broadcast %cst_40 : f32 to vector<8x128xf32>
    %122 = arith.mulf %121, %120 : vector<8x128xf32>
    %cst_41 = arith.constant 5.000000e-01 : f32
    %123 = vector.broadcast %cst_41 : f32 to vector<8x128xf32>
    %124 = arith.addf %122, %123 : vector<8x128xf32>
    %cst_42 = arith.constant 5.000000e-01 : f32
    %125 = vector.broadcast %cst_42 : f32 to vector<8x128xf32>
    %126 = arith.mulf %125, %115 : vector<8x128xf32>
    %127 = math.tanh %126 : vector<8x128xf32>
    %cst_43 = arith.constant 5.000000e-01 : f32
    %128 = vector.broadcast %cst_43 : f32 to vector<8x128xf32>
    %129 = arith.mulf %128, %127 : vector<8x128xf32>
    %cst_44 = arith.constant 5.000000e-01 : f32
    %130 = vector.broadcast %cst_44 : f32 to vector<8x128xf32>
    %131 = arith.addf %129, %130 : vector<8x128xf32>
    %132 = math.tanh %116 : vector<8x128xf32>
    %cst_45 = arith.constant 5.000000e-01 : f32
    %133 = vector.broadcast %cst_45 : f32 to vector<8x128xf32>
    %134 = arith.mulf %133, %117 : vector<8x128xf32>
    %135 = math.tanh %134 : vector<8x128xf32>
    %cst_46 = arith.constant 5.000000e-01 : f32
    %136 = vector.broadcast %cst_46 : f32 to vector<8x128xf32>
    %137 = arith.mulf %136, %135 : vector<8x128xf32>
    %cst_47 = arith.constant 5.000000e-01 : f32
    %138 = vector.broadcast %cst_47 : f32 to vector<8x128xf32>
    %139 = arith.addf %137, %138 : vector<8x128xf32>
    %140 = arith.mulf %131, %104 : vector<8x128xf32>
    %141 = arith.mulf %124, %132 : vector<8x128xf32>
    %142 = arith.addf %140, %141 : vector<8x128xf32>
    %143 = math.tanh %142 : vector<8x128xf32>
    %144 = arith.mulf %139, %143 : vector<8x128xf32>
    %145 = arith.addi %4, %c2_i32 : i32
    %146 = vector.broadcast %145 : i32 to vector<8x1xi32>
    %147 = arith.cmpi slt, %146, %3 : vector<8x1xi32>
    %148 = vector.shape_cast %147 : vector<8x1xi1> to vector<8x1xi1>
    %149 = vector.broadcast %148 : vector<8x1xi1> to vector<8x128xi1>
    %150 = arith.select %149, %144, %101 : vector<8x128xi1>, vector<8x128xf32>
    %151 = vector.shape_cast %147 : vector<8x1xi1> to vector<8x1xi1>
    %152 = vector.broadcast %151 : vector<8x1xi1> to vector<8x128xi1>
    %153 = arith.select %152, %142, %104 : vector<8x128xi1>, vector<8x128xf32>
    %c3_i32 = arith.constant 3 : i32
    %c8_i32_48 = arith.constant 8 : i32
    %154 = arith.muli %c3_i32, %c8_i32_48 : i32
    %155 = tpu.assume_multiple %154, 8 : i32
    %156 = arith.index_cast %155 : i32 to index
    %c0_49 = arith.constant 0 : index
    %157 = vector.load %arg2[%156, %c0_49] : memref<64x512xbf16, #tpu.memory_space<vmem>>, vector<8x512xbf16>
    %158 = arith.extf %157 : vector<8x512xbf16> to vector<8x512xf32>
    %159 = arith.truncf %150 : vector<8x128xf32> to vector<8x128xbf16>
    %c0_50 = arith.constant 0 : index
    %c0_51 = arith.constant 0 : index
    %160 = vector.load %arg3[%c0_50, %c0_51] : memref<128x512xbf16, #tpu.memory_space<vmem>>, vector<128x512xbf16>
    %cst_52 = arith.constant dense<0.000000e+00> : vector<8x512xf32>
    %161 = tpu.matmul %159, %160, %cst_52 {dimension_numbers = #tpu.dot_dimension_numbers<[1], [0], [0], [1], [0, 0, 1, 1], [], []>} : vector<8x128xbf16>, vector<128x512xbf16>, vector<8x512xf32> -> vector<8x512xf32>
    %162 = arith.addf %158, %161 : vector<8x512xf32>
    %163 = vector.extract_strided_slice %162 {offsets = [0, 0], sizes = [8, 128], strides = [1, 1]} : vector<8x512xf32> to vector<8x128xf32>
    %164 = vector.extract_strided_slice %162 {offsets = [0, 128], sizes = [8, 128], strides = [1, 1]} : vector<8x512xf32> to vector<8x128xf32>
    %165 = vector.extract_strided_slice %162 {offsets = [0, 256], sizes = [8, 128], strides = [1, 1]} : vector<8x512xf32> to vector<8x128xf32>
    %166 = vector.extract_strided_slice %162 {offsets = [0, 384], sizes = [8, 128], strides = [1, 1]} : vector<8x512xf32> to vector<8x128xf32>
    %cst_53 = arith.constant 5.000000e-01 : f32
    %167 = vector.broadcast %cst_53 : f32 to vector<8x128xf32>
    %168 = arith.mulf %167, %163 : vector<8x128xf32>
    %169 = math.tanh %168 : vector<8x128xf32>
    %cst_54 = arith.constant 5.000000e-01 : f32
    %170 = vector.broadcast %cst_54 : f32 to vector<8x128xf32>
    %171 = arith.mulf %170, %169 : vector<8x128xf32>
    %cst_55 = arith.constant 5.000000e-01 : f32
    %172 = vector.broadcast %cst_55 : f32 to vector<8x128xf32>
    %173 = arith.addf %171, %172 : vector<8x128xf32>
    %cst_56 = arith.constant 5.000000e-01 : f32
    %174 = vector.broadcast %cst_56 : f32 to vector<8x128xf32>
    %175 = arith.mulf %174, %164 : vector<8x128xf32>
    %176 = math.tanh %175 : vector<8x128xf32>
    %cst_57 = arith.constant 5.000000e-01 : f32
    %177 = vector.broadcast %cst_57 : f32 to vector<8x128xf32>
    %178 = arith.mulf %177, %176 : vector<8x128xf32>
    %cst_58 = arith.constant 5.000000e-01 : f32
    %179 = vector.broadcast %cst_58 : f32 to vector<8x128xf32>
    %180 = arith.addf %178, %179 : vector<8x128xf32>
    %181 = math.tanh %165 : vector<8x128xf32>
    %cst_59 = arith.constant 5.000000e-01 : f32
    %182 = vector.broadcast %cst_59 : f32 to vector<8x128xf32>
    %183 = arith.mulf %182, %166 : vector<8x128xf32>
    %184 = math.tanh %183 : vector<8x128xf32>
    %cst_60 = arith.constant 5.000000e-01 : f32
    %185 = vector.broadcast %cst_60 : f32 to vector<8x128xf32>
    %186 = arith.mulf %185, %184 : vector<8x128xf32>
    %cst_61 = arith.constant 5.000000e-01 : f32
    %187 = vector.broadcast %cst_61 : f32 to vector<8x128xf32>
    %188 = arith.addf %186, %187 : vector<8x128xf32>
    %189 = arith.mulf %180, %153 : vector<8x128xf32>
    %190 = arith.mulf %173, %181 : vector<8x128xf32>
    %191 = arith.addf %189, %190 : vector<8x128xf32>
    %192 = math.tanh %191 : vector<8x128xf32>
    %193 = arith.mulf %188, %192 : vector<8x128xf32>
    %194 = arith.addi %4, %c3_i32 : i32
    %195 = vector.broadcast %194 : i32 to vector<8x1xi32>
    %196 = arith.cmpi slt, %195, %3 : vector<8x1xi32>
    %197 = vector.shape_cast %196 : vector<8x1xi1> to vector<8x1xi1>
    %198 = vector.broadcast %197 : vector<8x1xi1> to vector<8x128xi1>
    %199 = arith.select %198, %193, %150 : vector<8x128xi1>, vector<8x128xf32>
    %200 = vector.shape_cast %196 : vector<8x1xi1> to vector<8x1xi1>
    %201 = vector.broadcast %200 : vector<8x1xi1> to vector<8x128xi1>
    %202 = arith.select %201, %191, %153 : vector<8x128xi1>, vector<8x128xf32>
    %c4_i32 = arith.constant 4 : i32
    %c8_i32_62 = arith.constant 8 : i32
    %203 = arith.muli %c4_i32, %c8_i32_62 : i32
    %204 = tpu.assume_multiple %203, 8 : i32
    %205 = arith.index_cast %204 : i32 to index
    %c0_63 = arith.constant 0 : index
    %206 = vector.load %arg2[%205, %c0_63] : memref<64x512xbf16, #tpu.memory_space<vmem>>, vector<8x512xbf16>
    %207 = arith.extf %206 : vector<8x512xbf16> to vector<8x512xf32>
    %208 = arith.truncf %199 : vector<8x128xf32> to vector<8x128xbf16>
    %c0_64 = arith.constant 0 : index
    %c0_65 = arith.constant 0 : index
    %209 = vector.load %arg3[%c0_64, %c0_65] : memref<128x512xbf16, #tpu.memory_space<vmem>>, vector<128x512xbf16>
    %cst_66 = arith.constant dense<0.000000e+00> : vector<8x512xf32>
    %210 = tpu.matmul %208, %209, %cst_66 {dimension_numbers = #tpu.dot_dimension_numbers<[1], [0], [0], [1], [0, 0, 1, 1], [], []>} : vector<8x128xbf16>, vector<128x512xbf16>, vector<8x512xf32> -> vector<8x512xf32>
    %211 = arith.addf %207, %210 : vector<8x512xf32>
    %212 = vector.extract_strided_slice %211 {offsets = [0, 0], sizes = [8, 128], strides = [1, 1]} : vector<8x512xf32> to vector<8x128xf32>
    %213 = vector.extract_strided_slice %211 {offsets = [0, 128], sizes = [8, 128], strides = [1, 1]} : vector<8x512xf32> to vector<8x128xf32>
    %214 = vector.extract_strided_slice %211 {offsets = [0, 256], sizes = [8, 128], strides = [1, 1]} : vector<8x512xf32> to vector<8x128xf32>
    %215 = vector.extract_strided_slice %211 {offsets = [0, 384], sizes = [8, 128], strides = [1, 1]} : vector<8x512xf32> to vector<8x128xf32>
    %cst_67 = arith.constant 5.000000e-01 : f32
    %216 = vector.broadcast %cst_67 : f32 to vector<8x128xf32>
    %217 = arith.mulf %216, %212 : vector<8x128xf32>
    %218 = math.tanh %217 : vector<8x128xf32>
    %cst_68 = arith.constant 5.000000e-01 : f32
    %219 = vector.broadcast %cst_68 : f32 to vector<8x128xf32>
    %220 = arith.mulf %219, %218 : vector<8x128xf32>
    %cst_69 = arith.constant 5.000000e-01 : f32
    %221 = vector.broadcast %cst_69 : f32 to vector<8x128xf32>
    %222 = arith.addf %220, %221 : vector<8x128xf32>
    %cst_70 = arith.constant 5.000000e-01 : f32
    %223 = vector.broadcast %cst_70 : f32 to vector<8x128xf32>
    %224 = arith.mulf %223, %213 : vector<8x128xf32>
    %225 = math.tanh %224 : vector<8x128xf32>
    %cst_71 = arith.constant 5.000000e-01 : f32
    %226 = vector.broadcast %cst_71 : f32 to vector<8x128xf32>
    %227 = arith.mulf %226, %225 : vector<8x128xf32>
    %cst_72 = arith.constant 5.000000e-01 : f32
    %228 = vector.broadcast %cst_72 : f32 to vector<8x128xf32>
    %229 = arith.addf %227, %228 : vector<8x128xf32>
    %230 = math.tanh %214 : vector<8x128xf32>
    %cst_73 = arith.constant 5.000000e-01 : f32
    %231 = vector.broadcast %cst_73 : f32 to vector<8x128xf32>
    %232 = arith.mulf %231, %215 : vector<8x128xf32>
    %233 = math.tanh %232 : vector<8x128xf32>
    %cst_74 = arith.constant 5.000000e-01 : f32
    %234 = vector.broadcast %cst_74 : f32 to vector<8x128xf32>
    %235 = arith.mulf %234, %233 : vector<8x128xf32>
    %cst_75 = arith.constant 5.000000e-01 : f32
    %236 = vector.broadcast %cst_75 : f32 to vector<8x128xf32>
    %237 = arith.addf %235, %236 : vector<8x128xf32>
    %238 = arith.mulf %229, %202 : vector<8x128xf32>
    %239 = arith.mulf %222, %230 : vector<8x128xf32>
    %240 = arith.addf %238, %239 : vector<8x128xf32>
    %241 = math.tanh %240 : vector<8x128xf32>
    %242 = arith.mulf %237, %241 : vector<8x128xf32>
    %243 = arith.addi %4, %c4_i32 : i32
    %244 = vector.broadcast %243 : i32 to vector<8x1xi32>
    %245 = arith.cmpi slt, %244, %3 : vector<8x1xi32>
    %246 = vector.shape_cast %245 : vector<8x1xi1> to vector<8x1xi1>
    %247 = vector.broadcast %246 : vector<8x1xi1> to vector<8x128xi1>
    %248 = arith.select %247, %242, %199 : vector<8x128xi1>, vector<8x128xf32>
    %249 = vector.shape_cast %245 : vector<8x1xi1> to vector<8x1xi1>
    %250 = vector.broadcast %249 : vector<8x1xi1> to vector<8x128xi1>
    %251 = arith.select %250, %240, %202 : vector<8x128xi1>, vector<8x128xf32>
    %c5_i32 = arith.constant 5 : i32
    %c8_i32_76 = arith.constant 8 : i32
    %252 = arith.muli %c5_i32, %c8_i32_76 : i32
    %253 = tpu.assume_multiple %252, 8 : i32
    %254 = arith.index_cast %253 : i32 to index
    %c0_77 = arith.constant 0 : index
    %255 = vector.load %arg2[%254, %c0_77] : memref<64x512xbf16, #tpu.memory_space<vmem>>, vector<8x512xbf16>
    %256 = arith.extf %255 : vector<8x512xbf16> to vector<8x512xf32>
    %257 = arith.truncf %248 : vector<8x128xf32> to vector<8x128xbf16>
    %c0_78 = arith.constant 0 : index
    %c0_79 = arith.constant 0 : index
    %258 = vector.load %arg3[%c0_78, %c0_79] : memref<128x512xbf16, #tpu.memory_space<vmem>>, vector<128x512xbf16>
    %cst_80 = arith.constant dense<0.000000e+00> : vector<8x512xf32>
    %259 = tpu.matmul %257, %258, %cst_80 {dimension_numbers = #tpu.dot_dimension_numbers<[1], [0], [0], [1], [0, 0, 1, 1], [], []>} : vector<8x128xbf16>, vector<128x512xbf16>, vector<8x512xf32> -> vector<8x512xf32>
    %260 = arith.addf %256, %259 : vector<8x512xf32>
    %261 = vector.extract_strided_slice %260 {offsets = [0, 0], sizes = [8, 128], strides = [1, 1]} : vector<8x512xf32> to vector<8x128xf32>
    %262 = vector.extract_strided_slice %260 {offsets = [0, 128], sizes = [8, 128], strides = [1, 1]} : vector<8x512xf32> to vector<8x128xf32>
    %263 = vector.extract_strided_slice %260 {offsets = [0, 256], sizes = [8, 128], strides = [1, 1]} : vector<8x512xf32> to vector<8x128xf32>
    %264 = vector.extract_strided_slice %260 {offsets = [0, 384], sizes = [8, 128], strides = [1, 1]} : vector<8x512xf32> to vector<8x128xf32>
    %cst_81 = arith.constant 5.000000e-01 : f32
    %265 = vector.broadcast %cst_81 : f32 to vector<8x128xf32>
    %266 = arith.mulf %265, %261 : vector<8x128xf32>
    %267 = math.tanh %266 : vector<8x128xf32>
    %cst_82 = arith.constant 5.000000e-01 : f32
    %268 = vector.broadcast %cst_82 : f32 to vector<8x128xf32>
    %269 = arith.mulf %268, %267 : vector<8x128xf32>
    %cst_83 = arith.constant 5.000000e-01 : f32
    %270 = vector.broadcast %cst_83 : f32 to vector<8x128xf32>
    %271 = arith.addf %269, %270 : vector<8x128xf32>
    %cst_84 = arith.constant 5.000000e-01 : f32
    %272 = vector.broadcast %cst_84 : f32 to vector<8x128xf32>
    %273 = arith.mulf %272, %262 : vector<8x128xf32>
    %274 = math.tanh %273 : vector<8x128xf32>
    %cst_85 = arith.constant 5.000000e-01 : f32
    %275 = vector.broadcast %cst_85 : f32 to vector<8x128xf32>
    %276 = arith.mulf %275, %274 : vector<8x128xf32>
    %cst_86 = arith.constant 5.000000e-01 : f32
    %277 = vector.broadcast %cst_86 : f32 to vector<8x128xf32>
    %278 = arith.addf %276, %277 : vector<8x128xf32>
    %279 = math.tanh %263 : vector<8x128xf32>
    %cst_87 = arith.constant 5.000000e-01 : f32
    %280 = vector.broadcast %cst_87 : f32 to vector<8x128xf32>
    %281 = arith.mulf %280, %264 : vector<8x128xf32>
    %282 = math.tanh %281 : vector<8x128xf32>
    %cst_88 = arith.constant 5.000000e-01 : f32
    %283 = vector.broadcast %cst_88 : f32 to vector<8x128xf32>
    %284 = arith.mulf %283, %282 : vector<8x128xf32>
    %cst_89 = arith.constant 5.000000e-01 : f32
    %285 = vector.broadcast %cst_89 : f32 to vector<8x128xf32>
    %286 = arith.addf %284, %285 : vector<8x128xf32>
    %287 = arith.mulf %278, %251 : vector<8x128xf32>
    %288 = arith.mulf %271, %279 : vector<8x128xf32>
    %289 = arith.addf %287, %288 : vector<8x128xf32>
    %290 = math.tanh %289 : vector<8x128xf32>
    %291 = arith.mulf %286, %290 : vector<8x128xf32>
    %292 = arith.addi %4, %c5_i32 : i32
    %293 = vector.broadcast %292 : i32 to vector<8x1xi32>
    %294 = arith.cmpi slt, %293, %3 : vector<8x1xi32>
    %295 = vector.shape_cast %294 : vector<8x1xi1> to vector<8x1xi1>
    %296 = vector.broadcast %295 : vector<8x1xi1> to vector<8x128xi1>
    %297 = arith.select %296, %291, %248 : vector<8x128xi1>, vector<8x128xf32>
    %298 = vector.shape_cast %294 : vector<8x1xi1> to vector<8x1xi1>
    %299 = vector.broadcast %298 : vector<8x1xi1> to vector<8x128xi1>
    %300 = arith.select %299, %289, %251 : vector<8x128xi1>, vector<8x128xf32>
    %c6_i32 = arith.constant 6 : i32
    %c8_i32_90 = arith.constant 8 : i32
    %301 = arith.muli %c6_i32, %c8_i32_90 : i32
    %302 = tpu.assume_multiple %301, 8 : i32
    %303 = arith.index_cast %302 : i32 to index
    %c0_91 = arith.constant 0 : index
    %304 = vector.load %arg2[%303, %c0_91] : memref<64x512xbf16, #tpu.memory_space<vmem>>, vector<8x512xbf16>
    %305 = arith.extf %304 : vector<8x512xbf16> to vector<8x512xf32>
    %306 = arith.truncf %297 : vector<8x128xf32> to vector<8x128xbf16>
    %c0_92 = arith.constant 0 : index
    %c0_93 = arith.constant 0 : index
    %307 = vector.load %arg3[%c0_92, %c0_93] : memref<128x512xbf16, #tpu.memory_space<vmem>>, vector<128x512xbf16>
    %cst_94 = arith.constant dense<0.000000e+00> : vector<8x512xf32>
    %308 = tpu.matmul %306, %307, %cst_94 {dimension_numbers = #tpu.dot_dimension_numbers<[1], [0], [0], [1], [0, 0, 1, 1], [], []>} : vector<8x128xbf16>, vector<128x512xbf16>, vector<8x512xf32> -> vector<8x512xf32>
    %309 = arith.addf %305, %308 : vector<8x512xf32>
    %310 = vector.extract_strided_slice %309 {offsets = [0, 0], sizes = [8, 128], strides = [1, 1]} : vector<8x512xf32> to vector<8x128xf32>
    %311 = vector.extract_strided_slice %309 {offsets = [0, 128], sizes = [8, 128], strides = [1, 1]} : vector<8x512xf32> to vector<8x128xf32>
    %312 = vector.extract_strided_slice %309 {offsets = [0, 256], sizes = [8, 128], strides = [1, 1]} : vector<8x512xf32> to vector<8x128xf32>
    %313 = vector.extract_strided_slice %309 {offsets = [0, 384], sizes = [8, 128], strides = [1, 1]} : vector<8x512xf32> to vector<8x128xf32>
    %cst_95 = arith.constant 5.000000e-01 : f32
    %314 = vector.broadcast %cst_95 : f32 to vector<8x128xf32>
    %315 = arith.mulf %314, %310 : vector<8x128xf32>
    %316 = math.tanh %315 : vector<8x128xf32>
    %cst_96 = arith.constant 5.000000e-01 : f32
    %317 = vector.broadcast %cst_96 : f32 to vector<8x128xf32>
    %318 = arith.mulf %317, %316 : vector<8x128xf32>
    %cst_97 = arith.constant 5.000000e-01 : f32
    %319 = vector.broadcast %cst_97 : f32 to vector<8x128xf32>
    %320 = arith.addf %318, %319 : vector<8x128xf32>
    %cst_98 = arith.constant 5.000000e-01 : f32
    %321 = vector.broadcast %cst_98 : f32 to vector<8x128xf32>
    %322 = arith.mulf %321, %311 : vector<8x128xf32>
    %323 = math.tanh %322 : vector<8x128xf32>
    %cst_99 = arith.constant 5.000000e-01 : f32
    %324 = vector.broadcast %cst_99 : f32 to vector<8x128xf32>
    %325 = arith.mulf %324, %323 : vector<8x128xf32>
    %cst_100 = arith.constant 5.000000e-01 : f32
    %326 = vector.broadcast %cst_100 : f32 to vector<8x128xf32>
    %327 = arith.addf %325, %326 : vector<8x128xf32>
    %328 = math.tanh %312 : vector<8x128xf32>
    %cst_101 = arith.constant 5.000000e-01 : f32
    %329 = vector.broadcast %cst_101 : f32 to vector<8x128xf32>
    %330 = arith.mulf %329, %313 : vector<8x128xf32>
    %331 = math.tanh %330 : vector<8x128xf32>
    %cst_102 = arith.constant 5.000000e-01 : f32
    %332 = vector.broadcast %cst_102 : f32 to vector<8x128xf32>
    %333 = arith.mulf %332, %331 : vector<8x128xf32>
    %cst_103 = arith.constant 5.000000e-01 : f32
    %334 = vector.broadcast %cst_103 : f32 to vector<8x128xf32>
    %335 = arith.addf %333, %334 : vector<8x128xf32>
    %336 = arith.mulf %327, %300 : vector<8x128xf32>
    %337 = arith.mulf %320, %328 : vector<8x128xf32>
    %338 = arith.addf %336, %337 : vector<8x128xf32>
    %339 = math.tanh %338 : vector<8x128xf32>
    %340 = arith.mulf %335, %339 : vector<8x128xf32>
    %341 = arith.addi %4, %c6_i32 : i32
    %342 = vector.broadcast %341 : i32 to vector<8x1xi32>
    %343 = arith.cmpi slt, %342, %3 : vector<8x1xi32>
    %344 = vector.shape_cast %343 : vector<8x1xi1> to vector<8x1xi1>
    %345 = vector.broadcast %344 : vector<8x1xi1> to vector<8x128xi1>
    %346 = arith.select %345, %340, %297 : vector<8x128xi1>, vector<8x128xf32>
    %347 = vector.shape_cast %343 : vector<8x1xi1> to vector<8x1xi1>
    %348 = vector.broadcast %347 : vector<8x1xi1> to vector<8x128xi1>
    %349 = arith.select %348, %338, %300 : vector<8x128xi1>, vector<8x128xf32>
    %c7_i32 = arith.constant 7 : i32
    %c8_i32_104 = arith.constant 8 : i32
    %350 = arith.muli %c7_i32, %c8_i32_104 : i32
    %351 = tpu.assume_multiple %350, 8 : i32
    %352 = arith.index_cast %351 : i32 to index
    %c0_105 = arith.constant 0 : index
    %353 = vector.load %arg2[%352, %c0_105] : memref<64x512xbf16, #tpu.memory_space<vmem>>, vector<8x512xbf16>
    %354 = arith.extf %353 : vector<8x512xbf16> to vector<8x512xf32>
    %355 = arith.truncf %346 : vector<8x128xf32> to vector<8x128xbf16>
    %c0_106 = arith.constant 0 : index
    %c0_107 = arith.constant 0 : index
    %356 = vector.load %arg3[%c0_106, %c0_107] : memref<128x512xbf16, #tpu.memory_space<vmem>>, vector<128x512xbf16>
    %cst_108 = arith.constant dense<0.000000e+00> : vector<8x512xf32>
    %357 = tpu.matmul %355, %356, %cst_108 {dimension_numbers = #tpu.dot_dimension_numbers<[1], [0], [0], [1], [0, 0, 1, 1], [], []>} : vector<8x128xbf16>, vector<128x512xbf16>, vector<8x512xf32> -> vector<8x512xf32>
    %358 = arith.addf %354, %357 : vector<8x512xf32>
    %359 = vector.extract_strided_slice %358 {offsets = [0, 0], sizes = [8, 128], strides = [1, 1]} : vector<8x512xf32> to vector<8x128xf32>
    %360 = vector.extract_strided_slice %358 {offsets = [0, 128], sizes = [8, 128], strides = [1, 1]} : vector<8x512xf32> to vector<8x128xf32>
    %361 = vector.extract_strided_slice %358 {offsets = [0, 256], sizes = [8, 128], strides = [1, 1]} : vector<8x512xf32> to vector<8x128xf32>
    %362 = vector.extract_strided_slice %358 {offsets = [0, 384], sizes = [8, 128], strides = [1, 1]} : vector<8x512xf32> to vector<8x128xf32>
    %cst_109 = arith.constant 5.000000e-01 : f32
    %363 = vector.broadcast %cst_109 : f32 to vector<8x128xf32>
    %364 = arith.mulf %363, %359 : vector<8x128xf32>
    %365 = math.tanh %364 : vector<8x128xf32>
    %cst_110 = arith.constant 5.000000e-01 : f32
    %366 = vector.broadcast %cst_110 : f32 to vector<8x128xf32>
    %367 = arith.mulf %366, %365 : vector<8x128xf32>
    %cst_111 = arith.constant 5.000000e-01 : f32
    %368 = vector.broadcast %cst_111 : f32 to vector<8x128xf32>
    %369 = arith.addf %367, %368 : vector<8x128xf32>
    %cst_112 = arith.constant 5.000000e-01 : f32
    %370 = vector.broadcast %cst_112 : f32 to vector<8x128xf32>
    %371 = arith.mulf %370, %360 : vector<8x128xf32>
    %372 = math.tanh %371 : vector<8x128xf32>
    %cst_113 = arith.constant 5.000000e-01 : f32
    %373 = vector.broadcast %cst_113 : f32 to vector<8x128xf32>
    %374 = arith.mulf %373, %372 : vector<8x128xf32>
    %cst_114 = arith.constant 5.000000e-01 : f32
    %375 = vector.broadcast %cst_114 : f32 to vector<8x128xf32>
    %376 = arith.addf %374, %375 : vector<8x128xf32>
    %377 = math.tanh %361 : vector<8x128xf32>
    %cst_115 = arith.constant 5.000000e-01 : f32
    %378 = vector.broadcast %cst_115 : f32 to vector<8x128xf32>
    %379 = arith.mulf %378, %362 : vector<8x128xf32>
    %380 = math.tanh %379 : vector<8x128xf32>
    %cst_116 = arith.constant 5.000000e-01 : f32
    %381 = vector.broadcast %cst_116 : f32 to vector<8x128xf32>
    %382 = arith.mulf %381, %380 : vector<8x128xf32>
    %cst_117 = arith.constant 5.000000e-01 : f32
    %383 = vector.broadcast %cst_117 : f32 to vector<8x128xf32>
    %384 = arith.addf %382, %383 : vector<8x128xf32>
    %385 = arith.mulf %376, %349 : vector<8x128xf32>
    %386 = arith.mulf %369, %377 : vector<8x128xf32>
    %387 = arith.addf %385, %386 : vector<8x128xf32>
    %388 = math.tanh %387 : vector<8x128xf32>
    %389 = arith.mulf %384, %388 : vector<8x128xf32>
    %390 = arith.addi %4, %c7_i32 : i32
    %391 = vector.broadcast %390 : i32 to vector<8x1xi32>
    %392 = arith.cmpi slt, %391, %3 : vector<8x1xi32>
    %393 = vector.shape_cast %392 : vector<8x1xi1> to vector<8x1xi1>
    %394 = vector.broadcast %393 : vector<8x1xi1> to vector<8x128xi1>
    %395 = arith.select %394, %389, %346 : vector<8x128xi1>, vector<8x128xf32>
    %396 = vector.shape_cast %392 : vector<8x1xi1> to vector<8x1xi1>
    %397 = vector.broadcast %396 : vector<8x1xi1> to vector<8x128xi1>
    %398 = arith.select %397, %387, %349 : vector<8x128xi1>, vector<8x128xf32>
    %c8_i32_118 = arith.constant 8 : i32
    %c0_119 = arith.constant 0 : index
    %c0_120 = arith.constant 0 : index
    %399 = vector.load %arg4[%c0_119, %c0_120] : memref<8x128xf32, #tpu.memory_space<vmem>>, vector<8x128xf32>
    tpu.vector_store %arg4[%c0_119, %c0_120], %395 {strides = array<i32>} : memref<8x128xf32, #tpu.memory_space<vmem>>, vector<8x128xf32>,
    %c0_121 = arith.constant 0 : index
    %c0_122 = arith.constant 0 : index
    %400 = vector.load %arg5[%c0_121, %c0_122] : memref<8x128xf32, #tpu.memory_space<vmem>>, vector<8x128xf32>
    tpu.vector_store %arg5[%c0_121, %c0_122], %398 {strides = array<i32>} : memref<8x128xf32, #tpu.memory_space<vmem>>, vector<8x128xf32>,
    return
  }
  func.func @transform_0(%arg0: i32) -> (i32, i32) {
    %c0_i32 = arith.constant 0 : i32
    %c0_i32_0 = arith.constant 0 : i32
    %c0_i32_1 = arith.constant 0 : i32
    return %c0_i32, %c0_i32_0 : i32, i32
  }
  func.func @transform_1(%arg0: i32) -> (i32, i32) {
    %c0_i32 = arith.constant 0 : i32
    %c0_i32_0 = arith.constant 0 : i32
    return %arg0, %c0_i32 : i32, i32
  }
  func.func @transform_2(%arg0: i32) -> (i32, i32) {
    %c0_i32 = arith.constant 0 : i32
    %c0_i32_0 = arith.constant 0 : i32
    %c0_i32_1 = arith.constant 0 : i32
    return %c0_i32, %c0_i32_0 : i32, i32
  }
  func.func @transform_3(%arg0: i32) -> (i32, i32) {
    %c0_i32 = arith.constant 0 : i32
    %c0_i32_0 = arith.constant 0 : i32
    %c0_i32_1 = arith.constant 0 : i32
    return %c0_i32, %c0_i32_0 : i32, i32
  }
}

</mosaic_0001>

<bundles_post_ra>
// kernel: lstm_encoder_pallas.1
= control target key start
LH: loop header
LB: loop body
LE: loop exit
PB: predicated region body
PF: predicated region fallthrough
CT: control target
= control target key end

     0   :  { %v1445_v1 = vmov 0   ;;  %v1446_v38 = vmov 0.0|0.0   ;;  %s2122_s2 = inlined_call_operand.vmem [shape: bf16[128,512], index: 2, kind: input, shape index: {}]   ;;  %s2123_s0 = inlined_call_operand.vmem [shape: s32[8,1], index: 0, kind: input, shape index: {}]   ;;  %s2124_s1 = inlined_call_operand.vmem [shape: bf16[64,512], index: 1, kind: input, shape index: {}]   ;;  %s2125_s3 = inlined_call_operand.vmem [shape: f32[8,128], index: 3, kind: output, shape index: {}]  }
   0x1   :  { %v1470_v0 = vld [vmem:[%s2122_s2 + $0x4] ss:$16 sps:$4 sm:$0xff]   ;;  %259 = vmatprep.mubr.bf16.mxu0 %v1445_v1  ;;  %300 = vmatprep.mubr.bf16.mxu1 %v1445_v1  ;;  %v1477_v2 = vld [vmem:[%s2122_s2] ss:$16 sps:$4 sm:$0xff]   ;;  %v1491_v4 = vld [vmem:[%s2122_s2 + $0xc] ss:$16 sps:$4 sm:$0xff]  }
   0x2   :  { %1277 = vset.pattern.permute.xlu0 %v1445_v1  ;;  %1278 = vset.pattern.permute.xlu1 %v1445_v1  ;;  %v1485_v3 = vld [vmem:[%s2122_s2 + $0x24] ss:$16 sps:$4 sm:$0xff]   ;;  %v1496_v5 = vld [vmem:[%s2122_s2 + $0x20] ss:$16 sps:$4 sm:$0xff]   ;;  %v1501_v6 = vld [vmem:[%s2122_s2 + $0x8] ss:$16 sps:$4 sm:$0xff]  }
   0x3   :  { %227 = vmatprep.subr.bf16.mxu0 %v1470_v0  ;;  %v1507_v7 = vld [vmem:[%s2122_s2 + $0x44] ss:$16 sps:$4 sm:$0xff]   ;;  %268 = vmatprep.subr.bf16.mxu1 %v1491_v4  ;;  %v1513_v8 = vld [vmem:[%s2122_s2 + $0x2c] ss:$16 sps:$4 sm:$0xff]   ;;  %v1519_v9 = vld [vmem:[%s2122_s2 + $0x28] ss:$16 sps:$4 sm:$0xff]  }
   0x4   :  { %228 = vmatpush1.bf16.msra.mxu0 %v1477_v2  ;;  %269 = vmatpush1.bf16.msra.mxu1 %v1501_v6  ;;  %v1526_v10 = vld [vmem:[%s2122_s2 + $0x40] ss:$16 sps:$4 sm:$0xff]   ;;  %v1532_v11 = vld [vmem:[%s2122_s2 + $0x64] ss:$16 sps:$4 sm:$0xff]   ;;  %v1537_v12 = vld [vmem:[%s2122_s2 + $0x4c] ss:$16 sps:$4 sm:$0xff]  }
   0x5   :  { %229 = vmatprep.subr.bf16.mxu0 %v1485_v3  ;;  %270 = vmatprep.subr.bf16.mxu1 %v1513_v8  ;;  %v1543_v13 = vld [vmem:[%s2122_s2 + $0x48] ss:$16 sps:$4 sm:$0xff]   ;;  %v1550_v14 = vld [vmem:[%s2122_s2 + $0x60] ss:$16 sps:$4 sm:$0xff]   ;;  %v1555_v15 = vld [vmem:[%s2122_s2 + $0x6c] ss:$16 sps:$4 sm:$0xff]  }
   0x6   :  { %v1561_v16 = vld [vmem:[%s2122_s2 + $0x84] ss:$16 sps:$4 sm:$0xff]   ;;  %v1567_v17 = vld [vmem:[%s2122_s2 + $0x80] ss:$16 sps:$4 sm:$0xff]   ;;  %v1572_v18 = vld [vmem:[%s2122_s2 + $0x68] ss:$16 sps:$4 sm:$0xff]  }
   0x7   :  { %v1579_v19 = vld [vmem:[%s2122_s2 + $0x8c] ss:$16 sps:$4 sm:$0xff]   ;;  %v1585_v20 = vld [vmem:[%s2122_s2 + $0xa4] ss:$16 sps:$4 sm:$0xff]   ;;  %v1591_v21 = vld [vmem:[%s2122_s2 + $0x88] ss:$16 sps:$4 sm:$0xff]  }
   0x8   :  { %230 = vmatpush1.bf16.msra.mxu0 %v1496_v5  ;;  %271 = vmatpush1.bf16.msra.mxu1 %v1519_v9  ;;  %v1598_v22 = vld [vmem:[%s2122_s2 + $0xa0] ss:$16 sps:$4 sm:$0xff]   ;;  %v1603_v23 = vld [vmem:[%s2122_s2 + $0xac] ss:$16 sps:$4 sm:$0xff]   ;;  %v1609_v24 = vld [vmem:[%s2122_s2 + $0xc4] ss:$16 sps:$4 sm:$0xff]  }
   0x9   :  { %231 = vmatprep.subr.bf16.mxu0 %v1507_v7  ;;  %272 = vmatprep.subr.bf16.mxu1 %v1537_v12  ;;  %v1614_v25 = vld [vmem:[%s2123_s0] sm:$0xff]  ;;  %v1620_v26 = vld [vmem:[%s2122_s2 + $0xa8] ss:$16 sps:$4 sm:$0xff]   ;;  %v1634_v28 = vld [vmem:[%s2122_s2 + $0xcc] ss:$16 sps:$4 sm:$0xff]  }
   0xa   :  { %vm1253_vm0 = vcmp.gt.s32.totalorder %v1614_v25, 0  ;;  %vm1256_vm1 = vcmp.gt.s32.totalorder %v1614_v25, 1  ;;  %v1629_v27 = vld [vmem:[%s2122_s2 + $0xc0] ss:$16 sps:$4 sm:$0xff]   ;;  %v1641_v30 = vld [vmem:[%s2122_s2 + $0xe4] ss:$16 sps:$4 sm:$0xff]  }
   0xb   :  { %v333_v29 = vsel %vm1253_vm0, 1, %v1445_v1  ;;  %v457_v31 = vsel %vm1256_vm1, 1, %v1445_v1  ;;  %v1648_v32 = vld [vmem:[%s2122_s2 + $0xc8] ss:$16 sps:$4 sm:$0xff]   ;;  %vm1265_vm2 = vcmp.gt.s32.totalorder %v1614_v25, 4  ;;  %vm1271_vm3 = vcmp.gt.s32.totalorder %v1614_v25, 6 }
   0xc   :  { %232 = vmatpush1.bf16.msra.mxu0 %v1526_v10  ;;  %273 = vmatpush1.bf16.msra.mxu1 %v1543_v13  ;;  %v1656_v33 = vld [vmem:[%s2122_s2 + $0xe0] ss:$16 sps:$4 sm:$0xff]   ;;  %v1661_v34 = vld [vmem:[%s2122_s2 + $0xec] ss:$16 sps:$4 sm:$0xff]   ;;  %v829_v35 = vsel %vm1265_vm2, 1, %v1445_v1  ;;  %v1077_v37 = vsel %vm1271_vm3, 1, %v1445_v1 }
   0xd   :  { %233 = vmatprep.subr.bf16.mxu0 %v1532_v11  ;;  %274 = vmatprep.subr.bf16.mxu1 %v1555_v15  ;;  %v1669_v36 = vld [vmem:[%s2122_s2 + $0xe8] ss:$16 sps:$4 sm:$0xff]   ;;  %v28_v39 = vld [vmem:[%s2124_s1] sm:$0xff]  ;;  %vm1259_vm6 = vcmp.gt.s32.totalorder %v1614_v25, 2  ;;  %vm1262_vm7 = vcmp.gt.s32.totalorder %v1614_v25, 3  ;;  %vm1268_vm8 = vcmp.gt.s32.totalorder %v1614_v25, 5 }
   0xe   :  { %335 = vperm.xlu0 %1277, %v333_v29   ;;  %v30_v40 = vunpack.c.l.bf16 %v28_v39  ;;  %v29_v41 = vld [vmem:[%s2124_s1 + $0x8] sm:$0xff]  ;;  %v31_v42 = vunpack.c.h.bf16 %v28_v39  ;;  %vm1274_vm9 = vcmp.gt.s32.totalorder %v1614_v25, 7 }
   0xf   :  { %v32_v44 = vunpack.c.l.bf16 %v29_v41  ;;  %v33_v55 = vunpack.c.h.bf16 %v29_v41 }
  0x10   :  { %234 = vmatpush1.bf16.msra.mxu0 %v1550_v14  ;;  %275 = vmatpush1.bf16.msra.mxu1 %v1572_v18 }
  0x11   :  { %235 = vmatprep.subr.bf16.mxu0 %v1561_v16  ;;  %276 = vmatprep.subr.bf16.mxu1 %v1579_v19 }
  0x12   :  { %459 = vperm.xlu0 %1277, %v457_v31  }
  0x14   :  { %236 = vmatpush1.bf16.msra.mxu0 %v1567_v17  ;;  %277 = vmatpush1.bf16.msra.mxu1 %v1591_v21 }
  0x15   :  { %237 = vmatprep.subr.bf16.mxu0 %v1585_v20  ;;  %278 = vmatprep.subr.bf16.mxu1 %v1603_v23 }
  0x16   :  { %831 = vperm.xlu0 %1277, %v829_v35  }
  0x18   :  { %238 = vmatpush1.bf16.msra.mxu0 %v1598_v22  ;;  %279 = vmatpush1.bf16.msra.mxu1 %v1620_v26 }
  0x19   :  { %239 = vmatprep.subr.bf16.mxu0 %v1609_v24  ;;  %280 = vmatprep.subr.bf16.mxu1 %v1634_v28 }
  0x1a   :  { %1079 = vperm.xlu0 %1277, %v1077_v37  }
  0x1c   :  { %240 = vmatpush1.bf16.msra.mxu0 %v1629_v27  ;;  %281 = vmatpush1.bf16.msra.mxu1 %v1648_v32 }
  0x1d   :  { %241 = vmatprep.subr.bf16.mxu0 %v1641_v30  ;;  %282 = vmatprep.subr.bf16.mxu1 %v1661_v34 }
  0x20   :  { %242 = vmatpush1.bf16.msra.mxu0 %v1656_v33  ;;  %283 = vmatpush1.bf16.msra.mxu1 %v1669_v36 }
  0x21   :  { %350 = vmatprep.subr.bf16.mxu0 %v1470_v0  ;;  %391 = vmatprep.subr.bf16.mxu1 %v1491_v4 }
  0x23   :  { %260 = vmatmul.mubr.bf16.vlgmr.msra.gmra.mrb[0].mxu0 %v1446_v38  ;;  %301 = vmatmul.mubr.bf16.vlgmr.msra.gmra.mrb[0].mxu1 %v1446_v38 }
  0x24   :  { %351 = vmatpush1.bf16.msra.mxu0 %v1477_v2  ;;  %382 = vmatprep.mubr.bf16.mxu0 %v1445_v1 }
  0x25   :  { %352 = vmatprep.subr.bf16.mxu0 %v1485_v3  ;;  %392 = vmatpush1.bf16.msra.mxu1 %v1501_v6 }
  0x26   :  { %423 = vmatprep.mubr.bf16.mxu1 %v1445_v1  ;;  %393 = vmatprep.subr.bf16.mxu1 %v1513_v8 }
  0x28   :  { %353 = vmatpush1.bf16.msra.mxu0 %v1496_v5 }
  0x29   :  { %354 = vmatprep.subr.bf16.mxu0 %v1507_v7  ;;  %394 = vmatpush1.bf16.msra.mxu1 %v1519_v9 }
  0x2a   :  { %395 = vmatprep.subr.bf16.mxu1 %v1537_v12 }
  0x2c   :  { %355 = vmatpush1.bf16.msra.mxu0 %v1526_v10 }
  0x2d   :  { %356 = vmatprep.subr.bf16.mxu0 %v1532_v11  ;;  %396 = vmatpush1.bf16.msra.mxu1 %v1543_v13 }
  0x2e   :  { %397 = vmatprep.subr.bf16.mxu1 %v1555_v15 }
  0x30   :  { %357 = vmatpush1.bf16.msra.mxu0 %v1550_v14 }
  0x31   :  { %358 = vmatprep.subr.bf16.mxu0 %v1561_v16  ;;  %398 = vmatpush1.bf16.msra.mxu1 %v1572_v18 }
  0x32   :  { %399 = vmatprep.subr.bf16.mxu1 %v1579_v19 }
  0x34   :  { %359 = vmatpush1.bf16.msra.mxu0 %v1567_v17 }
  0x35   :  { %360 = vmatprep.subr.bf16.mxu0 %v1585_v20  ;;  %400 = vmatpush1.bf16.msra.mxu1 %v1591_v21 }
  0x36   :  { %401 = vmatprep.subr.bf16.mxu1 %v1603_v23 }
  0x38   :  { %361 = vmatpush1.bf16.msra.mxu0 %v1598_v22 }
  0x39   :  { %362 = vmatprep.subr.bf16.mxu0 %v1609_v24  ;;  %402 = vmatpush1.bf16.msra.mxu1 %v1620_v26 }
  0x3a   :  { %403 = vmatprep.subr.bf16.mxu1 %v1634_v28 }
  0x3c   :  { %363 = vmatpush1.bf16.msra.mxu0 %v1629_v27 }
  0x3d   :  { %364 = vmatprep.subr.bf16.mxu0 %v1641_v30  ;;  %404 = vmatpush1.bf16.msra.mxu1 %v1648_v32 }
  0x3e   :  { %405 = vmatprep.subr.bf16.mxu1 %v1661_v34 }
  0x40   :  { %365 = vmatpush1.bf16.msra.mxu0 %v1656_v33 }
  0x41   :  { %474 = vmatprep.subr.bf16.mxu0 %v1470_v0  ;;  %406 = vmatpush1.bf16.msra.mxu1 %v1669_v36 }
  0x42   :  { %515 = vmatprep.subr.bf16.mxu1 %v1491_v4 }
  0x8d   :  { %v336_v37 = vpop.permute.xlu0 %335 }
  0x8e   :  { %vm337_vm4 = vcmp.eq.s32.totalorder %v336_v37, 1 }
  0x8f   :  { %vm1439_vm5 = vmpackc.low %vm337_vm4, %vm337_vm4 }
  0xf6   :  { %v261_v43 = vpop.f32.mrb[0].mxu0  ;;  %v302_v51 = vpop.f32.mrb[0].mxu1 }
  0xf7   :  { %v309_v45 = vadd.f32 %v261_v43, %v30_v40  ;;  %v263_v46 = vpop.f32.mrb[1].mxu0  ;;  %v311_v53 = vadd.f32 %v302_v51, %v32_v44  ;;  %v304_v54 = vpop.f32.mrb[1].mxu1  ;;  %v953_v51 = vsel %vm1268_vm8, 1, %v1445_v1 }
  0xf8   :  { %v310_v47 = vadd.f32 %v263_v46, %v31_v42  ;;  %v265_v48 = vpop.f32.mrb[2].mxu0  ;;  %v306_v56 = vpop.f32.mrb[2].mxu1  ;;  %v312_v58 = vadd.f32 %v304_v54, %v33_v55  ;;  %v1255_v55 = vld [vmem:[%s2124_s1 + $0x18] sm:$0xff] }
  0xf9   :  { %v313_v49 = vmul.f32 0.5, %v309_v45  ;;  %v266_v50 = vpop.f32.mrb[3].mxu0  ;;  %v307_v57 = vpop.f32.mrb[3].mxu1 }
  0xfa   :  { %v317_v52 = vmul.f32 0.5, %v310_v47  ;;  %v322_v59 = vmul.f32 0.5, %v312_v58  ;;  %v705_v50 = vsel %vm1262_vm7, 1, %v1445_v1 }
  0xfb   :  { %1327 = vtanh.f32 %v313_v49  ;;  %v581_v49 = vsel %vm1259_vm6, 1, %v1445_v1 }
  0xfc   :  { %1329 = vtanh.f32 %v317_v52  ;;  %583 = vperm.xlu1 %1278, %v581_v49   ;;  %v1201_v52 = vsel %vm1274_vm9, 1, %v1445_v1 }
  0xfd   :  { %1331 = vtanh.f32 %v311_v53  ;;  %v1254_v53 = vld [vmem:[%s2124_s1 + $0x10] sm:$0xff] }
  0xfe   :  { %1333 = vtanh.f32 %v322_v59  ;;  %v345_v54 = vunpack.c.l.bf16 %v1254_v53  ;;  %v346_v56 = vunpack.c.h.bf16 %v1254_v53 }
 0x100   :  { %707 = vperm.xlu1 %1278, %v705_v50  }
 0x104   :  { %955 = vperm.xlu1 %1278, %v953_v51  }
 0x105   :  { %v1328_v60 = vpop.eup %1327 }
 0x106   :  { %v1330_v61 = vpop.eup %1329  ;;  %v315_v62 = vmul.f32 0.5, %v1328_v60  ;;  %v347_v60 = vunpack.c.l.bf16 %v1255_v55 }
 0x107   :  { %v1332_v63 = vpop.eup %1331  ;;  %v319_v29 = vmul.f32 0.5, %v1330_v61 }
 0x108   :  { %v316_v31 = vadd.f32 0.5, %v315_v62  ;;  %v1334_v42 = vpop.eup %1333  ;;  %1203 = vperm.xlu1 %1278, %v1201_v52  }
 0x109   :  { %v320_v35 = vadd.f32 0.5, %v319_v29  ;;  %v324_v43 = vmul.f32 0.5, %v1334_v42 }
 0x10a   :  { %v327_v38 = vmul.f32 %v1332_v63, %v316_v31 }
 0x10b   :  { %v326_v39 = vmul.f32 0.0, %v320_v35  ;;  %v325_v44 = vadd.f32 0.5, %v324_v43 }
 0x10d   :  { %v328_v40 = vadd.f32 %v327_v38, %v326_v39 }
 0x10f   :  { %1335 = vtanh.f32 %v328_v40  ;;  %v1718_v41 = vsel %vm337_vm4, %v328_v40, 0.0  ;;  %v348_v40 = vunpack.c.h.bf16 %v1255_v55 }
 0x119   :  { %v1336_v45 = vpop.eup %1335 }
 0x11a   :  { %v330_v46 = vmul.f32 %v1336_v45, %v325_v44 }
 0x11c   :  { %v1720_v47 = vsel %vm337_vm4, %v330_v46, 0.0  ;;  %v1440_v48 = vpack.c.bf16 %v330_v46, %v330_v46 }
 0x11e   :  { %1441 = vmatmul.mubr.msk.bf16.vlgmr.msra.gmra.mrb[4].mxu0 %vm1439_vm5, %v1440_v48  ;;  %1444 = vmatmul.mubr.msk.bf16.vlgmr.msra.gmra.mrb[4].mxu1 %vm1439_vm5, %v1440_v48 }
 0x11f   :  { %475 = vmatpush1.bf16.msra.mxu0 %v1477_v2  ;;  %516 = vmatpush1.bf16.msra.mxu1 %v1501_v6 }
 0x120   :  { %476 = vmatprep.subr.bf16.mxu0 %v1485_v3  ;;  %517 = vmatprep.subr.bf16.mxu1 %v1513_v8 }
 0x121   :  { %506 = vmatprep.mubr.bf16.mxu0 %v1445_v1  ;;  %547 = vmatprep.mubr.bf16.mxu1 %v1445_v1 }
 0x123   :  { %477 = vmatpush1.bf16.msra.mxu0 %v1496_v5  ;;  %518 = vmatpush1.bf16.msra.mxu1 %v1519_v9 }
 0x124   :  { %478 = vmatprep.subr.bf16.mxu0 %v1507_v7  ;;  %519 = vmatprep.subr.bf16.mxu1 %v1537_v12 }
 0x127   :  { %479 = vmatpush1.bf16.msra.mxu0 %v1526_v10  ;;  %520 = vmatpush1.bf16.msra.mxu1 %v1543_v13 }
 0x128   :  { %480 = vmatprep.subr.bf16.mxu0 %v1532_v11  ;;  %521 = vmatprep.subr.bf16.mxu1 %v1555_v15 }
 0x12b   :  { %481 = vmatpush1.bf16.msra.mxu0 %v1550_v14  ;;  %522 = vmatpush1.bf16.msra.mxu1 %v1572_v18 }
 0x12c   :  { %482 = vmatprep.subr.bf16.mxu0 %v1561_v16  ;;  %523 = vmatprep.subr.bf16.mxu1 %v1579_v19 }
 0x12f   :  { %483 = vmatpush1.bf16.msra.mxu0 %v1567_v17  ;;  %524 = vmatpush1.bf16.msra.mxu1 %v1591_v21 }
 0x130   :  { %484 = vmatprep.subr.bf16.mxu0 %v1585_v20  ;;  %525 = vmatprep.subr.bf16.mxu1 %v1603_v23 }
 0x133   :  { %485 = vmatpush1.bf16.msra.mxu0 %v1598_v22  ;;  %526 = vmatpush1.bf16.msra.mxu1 %v1620_v26 }
 0x134   :  { %486 = vmatprep.subr.bf16.mxu0 %v1609_v24  ;;  %527 = vmatprep.subr.bf16.mxu1 %v1634_v28 }
 0x137   :  { %487 = vmatpush1.bf16.msra.mxu0 %v1629_v27  ;;  %528 = vmatpush1.bf16.msra.mxu1 %v1648_v32 }
 0x138   :  { %488 = vmatprep.subr.bf16.mxu0 %v1641_v30  ;;  %529 = vmatprep.subr.bf16.mxu1 %v1661_v34 }
 0x13b   :  { %489 = vmatpush1.bf16.msra.mxu0 %v1656_v33  ;;  %530 = vmatpush1.bf16.msra.mxu1 %v1669_v36 }
 0x13c   :  { %598 = vmatprep.subr.bf16.mxu0 %v1470_v0  ;;  %639 = vmatprep.subr.bf16.mxu1 %v1491_v4 }
 0x1f1   :  { %v384_v57 = vpop.f32.mrb[4].mxu0  ;;  %v425_v58 = vpop.f32.mrb[4].mxu1 }
 0x1f2   :  { %v432_v59 = vadd.f32 %v384_v57, %v345_v54  ;;  %v386_v61 = vpop.f32.mrb[5].mxu0  ;;  %v427_v25 = vpop.f32.mrb[5].mxu1  ;;  %v434_v39 = vadd.f32 %v425_v58, %v347_v60 }
 0x1f3   :  { %v433_v62 = vadd.f32 %v386_v61, %v346_v56  ;;  %v388_v63 = vpop.f32.mrb[6].mxu0  ;;  %v429_v29 = vpop.f32.mrb[6].mxu1  ;;  %v435_v42 = vadd.f32 %v427_v25, %v348_v40 }
 0x1f4   :  { %v436_v31 = vmul.f32 0.5, %v432_v59  ;;  %v389_v35 = vpop.f32.mrb[7].mxu0  ;;  %v430_v37 = vpop.f32.mrb[7].mxu1  ;;  %v1258_v63 = vld [vmem:[%s2124_s1 + $0x28] sm:$0xff] }
 0x1f5   :  { %v440_v38 = vmul.f32 0.5, %v433_v62  ;;  %v445_v43 = vmul.f32 0.5, %v435_v42  ;;  %v460_v54 = vpop.permute.xlu0 %459 }
 0x1f6   :  { %1337 = vtanh.f32 %v436_v31  ;;  %vm461_vm10 = vcmp.eq.s32.totalorder %v460_v54, 1 }
 0x1f7   :  { %1339 = vtanh.f32 %v440_v38  ;;  %v471_v38 = vunpack.c.l.bf16 %v1258_v63 }
 0x1f8   :  { %1341 = vtanh.f32 %v434_v39 }
 0x1f9   :  { %1343 = vtanh.f32 %v445_v43 }
 0x200   :  { %v1338_v44 = vpop.eup %1337 }
 0x201   :  { %v1340_v45 = vpop.eup %1339  ;;  %v438_v46 = vmul.f32 0.5, %v1338_v44 }
 0x202   :  { %v442_v48 = vmul.f32 0.5, %v1340_v45  ;;  %v1342_v50 = vpop.eup %1341 }
 0x203   :  { %v439_v49 = vadd.f32 0.5, %v438_v46  ;;  %v1344_v57 = vpop.eup %1343 }
 0x204   :  { %v443_v51 = vadd.f32 0.5, %v442_v48  ;;  %v447_v58 = vmul.f32 0.5, %v1344_v57 }
 0x205   :  { %v450_v52 = vmul.f32 %v1342_v50, %v439_v49 }
 0x206   :  { %v449_v53 = vmul.f32 %v443_v51, %v1718_v41  ;;  %v448_v59 = vadd.f32 0.5, %v447_v58  ;;  %v472_v51 = vunpack.c.h.bf16 %v1258_v63 }
 0x208   :  { %v451_v56 = vadd.f32 %v450_v52, %v449_v53 }
 0x20a   :  { %1345 = vtanh.f32 %v451_v56  ;;  %v1772_v55 = vsel %vm461_vm10, %v451_v56, %v1718_v41  ;;  %v1257_v41 = vld [vmem:[%s2124_s1 + $0x20] sm:$0xff] }
 0x20b   :  { %v470_v29 = vunpack.c.h.bf16 %v1257_v41 }
 0x214   :  { %v1346_v60 = vpop.eup %1345 }
 0x215   :  { %v453_v61 = vmul.f32 %v1346_v60, %v448_v59 }
 0x217   :  { %v1775_v25 = vsel %vm461_vm10, %v453_v61, %v1720_v47  ;;  %v469_v47 = vunpack.c.l.bf16 %v1257_v41 }
 0x218   :  { %v473_v62 = vpack.c.bf16 %v1775_v25, %v1775_v25 }
 0x21a   :  { %507 = vmatmul.mubr.bf16.vlgmr.msra.gmra.mrb[8].mxu0 %v473_v62  ;;  %548 = vmatmul.mubr.bf16.vlgmr.msra.gmra.mrb[8].mxu1 %v473_v62  ;;  %v584_v62 = vpop.permute.xlu1 %583 }
 0x21b   :  { %599 = vmatpush1.bf16.msra.mxu0 %v1477_v2  ;;  %640 = vmatpush1.bf16.msra.mxu1 %v1501_v6  ;;  %vm585_vm11 = vcmp.eq.s32.totalorder %v584_v62, 1 }
 0x21c   :  { %600 = vmatprep.subr.bf16.mxu0 %v1485_v3  ;;  %641 = vmatprep.subr.bf16.mxu1 %v1513_v8 }
 0x21d   :  { %630 = vmatprep.mubr.bf16.mxu0 %v1445_v1  ;;  %671 = vmatprep.mubr.bf16.mxu1 %v1445_v1 }
 0x21f   :  { %601 = vmatpush1.bf16.msra.mxu0 %v1496_v5  ;;  %642 = vmatpush1.bf16.msra.mxu1 %v1519_v9 }
 0x220   :  { %602 = vmatprep.subr.bf16.mxu0 %v1507_v7  ;;  %643 = vmatprep.subr.bf16.mxu1 %v1537_v12 }
 0x223   :  { %603 = vmatpush1.bf16.msra.mxu0 %v1526_v10  ;;  %644 = vmatpush1.bf16.msra.mxu1 %v1543_v13 }
 0x224   :  { %604 = vmatprep.subr.bf16.mxu0 %v1532_v11  ;;  %645 = vmatprep.subr.bf16.mxu1 %v1555_v15 }
 0x227   :  { %605 = vmatpush1.bf16.msra.mxu0 %v1550_v14  ;;  %646 = vmatpush1.bf16.msra.mxu1 %v1572_v18 }
 0x228   :  { %606 = vmatprep.subr.bf16.mxu0 %v1561_v16  ;;  %647 = vmatprep.subr.bf16.mxu1 %v1579_v19 }
 0x22b   :  { %607 = vmatpush1.bf16.msra.mxu0 %v1567_v17  ;;  %648 = vmatpush1.bf16.msra.mxu1 %v1591_v21 }
 0x22c   :  { %608 = vmatprep.subr.bf16.mxu0 %v1585_v20  ;;  %649 = vmatprep.subr.bf16.mxu1 %v1603_v23 }
 0x22f   :  { %609 = vmatpush1.bf16.msra.mxu0 %v1598_v22  ;;  %650 = vmatpush1.bf16.msra.mxu1 %v1620_v26 }
 0x230   :  { %610 = vmatprep.subr.bf16.mxu0 %v1609_v24  ;;  %651 = vmatprep.subr.bf16.mxu1 %v1634_v28 }
 0x233   :  { %611 = vmatpush1.bf16.msra.mxu0 %v1629_v27  ;;  %652 = vmatpush1.bf16.msra.mxu1 %v1648_v32 }
 0x234   :  { %612 = vmatprep.subr.bf16.mxu0 %v1641_v30  ;;  %653 = vmatprep.subr.bf16.mxu1 %v1661_v34 }
 0x237   :  { %613 = vmatpush1.bf16.msra.mxu0 %v1656_v33  ;;  %654 = vmatpush1.bf16.msra.mxu1 %v1669_v36 }
 0x238   :  { %722 = vmatprep.subr.bf16.mxu0 %v1470_v0  ;;  %763 = vmatprep.subr.bf16.mxu1 %v1491_v4 }
 0x2ed   :  { %v508_v31 = vpop.f32.mrb[8].mxu0  ;;  %v549_v35 = vpop.f32.mrb[8].mxu1 }
 0x2ee   :  { %v556_v37 = vadd.f32 %v508_v31, %v469_v47  ;;  %v510_v39 = vpop.f32.mrb[9].mxu0  ;;  %v551_v40 = vpop.f32.mrb[9].mxu1  ;;  %v558_v50 = vadd.f32 %v549_v35, %v471_v38 }
 0x2ef   :  { %v557_v42 = vadd.f32 %v510_v39, %v470_v29  ;;  %v512_v43 = vpop.f32.mrb[10].mxu0  ;;  %v553_v44 = vpop.f32.mrb[10].mxu1  ;;  %v559_v52 = vadd.f32 %v551_v40, %v472_v51 }
 0x2f0   :  { %v560_v45 = vmul.f32 0.5, %v556_v37  ;;  %v513_v46 = vpop.f32.mrb[11].mxu0  ;;  %v554_v48 = vpop.f32.mrb[11].mxu1  ;;  %v1261_v43 = vld [vmem:[%s2124_s1 + $0x38] sm:$0xff] }
 0x2f1   :  { %v564_v49 = vmul.f32 0.5, %v557_v42  ;;  %v569_v53 = vmul.f32 0.5, %v559_v52 }
 0x2f2   :  { %1347 = vtanh.f32 %v560_v45 }
 0x2f3   :  { %1349 = vtanh.f32 %v564_v49  ;;  %v595_v49 = vunpack.c.l.bf16 %v1261_v43 }
 0x2f4   :  { %1351 = vtanh.f32 %v558_v50 }
 0x2f5   :  { %1353 = vtanh.f32 %v569_v53 }
 0x2fc   :  { %v1348_v54 = vpop.eup %1347 }
 0x2fd   :  { %v1350_v56 = vpop.eup %1349  ;;  %v562_v57 = vmul.f32 0.5, %v1348_v54 }
 0x2fe   :  { %v566_v58 = vmul.f32 0.5, %v1350_v56  ;;  %v1352_v60 = vpop.eup %1351 }
 0x2ff   :  { %v563_v59 = vadd.f32 0.5, %v562_v57  ;;  %v1354_v31 = vpop.eup %1353 }
 0x300   :  { %v567_v61 = vadd.f32 0.5, %v566_v58  ;;  %v571_v35 = vmul.f32 0.5, %v1354_v31 }
 0x301   :  { %v574_v41 = vmul.f32 %v1352_v60, %v563_v59 }
 0x302   :  { %v573_v47 = vmul.f32 %v567_v61, %v1772_v55  ;;  %v572_v37 = vadd.f32 0.5, %v571_v35  ;;  %v596_v61 = vunpack.c.h.bf16 %v1261_v43 }
 0x304   :  { %v575_v29 = vadd.f32 %v574_v41, %v573_v47 }
 0x306   :  { %1355 = vtanh.f32 %v575_v29  ;;  %v1821_v63 = vsel %vm585_vm11, %v575_v29, %v1772_v55  ;;  %v1260_v55 = vld [vmem:[%s2124_s1 + $0x30] sm:$0xff] }
 0x307   :  { %v594_v44 = vunpack.c.h.bf16 %v1260_v55 }
 0x310   :  { %v1356_v38 = vpop.eup %1355 }
 0x311   :  { %v577_v39 = vmul.f32 %v1356_v38, %v572_v37 }
 0x313   :  { %v1824_v40 = vsel %vm585_vm11, %v577_v39, %v1775_v25  ;;  %v593_v25 = vunpack.c.l.bf16 %v1260_v55 }
 0x314   :  { %v597_v42 = vpack.c.bf16 %v1824_v40, %v1824_v40 }
 0x316   :  { %631 = vmatmul.mubr.bf16.vlgmr.msra.gmra.mrb[12].mxu0 %v597_v42  ;;  %672 = vmatmul.mubr.bf16.vlgmr.msra.gmra.mrb[12].mxu1 %v597_v42 }
 0x317   :  { %723 = vmatpush1.bf16.msra.mxu0 %v1477_v2  ;;  %764 = vmatpush1.bf16.msra.mxu1 %v1501_v6 }
 0x318   :  { %724 = vmatprep.subr.bf16.mxu0 %v1485_v3  ;;  %765 = vmatprep.subr.bf16.mxu1 %v1513_v8 }
 0x319   :  { %754 = vmatprep.mubr.bf16.mxu0 %v1445_v1  ;;  %795 = vmatprep.mubr.bf16.mxu1 %v1445_v1 }
 0x31b   :  { %725 = vmatpush1.bf16.msra.mxu0 %v1496_v5  ;;  %766 = vmatpush1.bf16.msra.mxu1 %v1519_v9 }
 0x31c   :  { %726 = vmatprep.subr.bf16.mxu0 %v1507_v7  ;;  %767 = vmatprep.subr.bf16.mxu1 %v1537_v12 }
 0x31f   :  { %727 = vmatpush1.bf16.msra.mxu0 %v1526_v10  ;;  %768 = vmatpush1.bf16.msra.mxu1 %v1543_v13 }
 0x320   :  { %728 = vmatprep.subr.bf16.mxu0 %v1532_v11  ;;  %769 = vmatprep.subr.bf16.mxu1 %v1555_v15 }
 0x323   :  { %729 = vmatpush1.bf16.msra.mxu0 %v1550_v14  ;;  %770 = vmatpush1.bf16.msra.mxu1 %v1572_v18 }
 0x324   :  { %730 = vmatprep.subr.bf16.mxu0 %v1561_v16  ;;  %771 = vmatprep.subr.bf16.mxu1 %v1579_v19 }
 0x327   :  { %731 = vmatpush1.bf16.msra.mxu0 %v1567_v17  ;;  %772 = vmatpush1.bf16.msra.mxu1 %v1591_v21 }
 0x328   :  { %732 = vmatprep.subr.bf16.mxu0 %v1585_v20  ;;  %773 = vmatprep.subr.bf16.mxu1 %v1603_v23 }
 0x32b   :  { %733 = vmatpush1.bf16.msra.mxu0 %v1598_v22  ;;  %774 = vmatpush1.bf16.msra.mxu1 %v1620_v26 }
 0x32c   :  { %734 = vmatprep.subr.bf16.mxu0 %v1609_v24  ;;  %775 = vmatprep.subr.bf16.mxu1 %v1634_v28 }
 0x32f   :  { %735 = vmatpush1.bf16.msra.mxu0 %v1629_v27  ;;  %776 = vmatpush1.bf16.msra.mxu1 %v1648_v32 }
 0x330   :  { %736 = vmatprep.subr.bf16.mxu0 %v1641_v30  ;;  %777 = vmatprep.subr.bf16.mxu1 %v1661_v34 }
 0x333   :  { %737 = vmatpush1.bf16.msra.mxu0 %v1656_v33  ;;  %778 = vmatpush1.bf16.msra.mxu1 %v1669_v36 }
 0x334   :  { %846 = vmatprep.subr.bf16.mxu0 %v1470_v0  ;;  %887 = vmatprep.subr.bf16.mxu1 %v1491_v4 }
 0x3e9   :  { %v632_v45 = vpop.f32.mrb[12].mxu0  ;;  %v673_v46 = vpop.f32.mrb[12].mxu1 }
 0x3ea   :  { %v680_v48 = vadd.f32 %v632_v45, %v593_v25  ;;  %v634_v50 = vpop.f32.mrb[13].mxu0  ;;  %v675_v51 = vpop.f32.mrb[13].mxu1  ;;  %v682_v60 = vadd.f32 %v673_v46, %v595_v49 }
 0x3eb   :  { %v681_v52 = vadd.f32 %v634_v50, %v594_v44  ;;  %v636_v53 = vpop.f32.mrb[14].mxu0  ;;  %v677_v54 = vpop.f32.mrb[14].mxu1  ;;  %v683_v62 = vadd.f32 %v675_v51, %v596_v61 }
 0x3ec   :  { %v684_v56 = vmul.f32 0.5, %v680_v48  ;;  %v637_v57 = vpop.f32.mrb[15].mxu0  ;;  %v678_v58 = vpop.f32.mrb[15].mxu1 }
 0x3ed   :  { %v688_v59 = vmul.f32 0.5, %v681_v52  ;;  %v693_v41 = vmul.f32 0.5, %v683_v62  ;;  %v708_v25 = vpop.permute.xlu1 %707 }
 0x3ee   :  { %1357 = vtanh.f32 %v684_v56  ;;  %vm709_vm12 = vcmp.eq.s32.totalorder %v708_v25, 1 }
 0x3ef   :  { %1359 = vtanh.f32 %v688_v59 }
 0x3f0   :  { %1361 = vtanh.f32 %v682_v60 }
 0x3f1   :  { %1363 = vtanh.f32 %v693_v41 }
 0x3f8   :  { %v1358_v47 = vpop.eup %1357 }
 0x3f9   :  { %v1360_v29 = vpop.eup %1359  ;;  %v686_v31 = vmul.f32 0.5, %v1358_v47 }
 0x3fa   :  { %v690_v35 = vmul.f32 0.5, %v1360_v29  ;;  %v1362_v38 = vpop.eup %1361 }
 0x3fb   :  { %v687_v37 = vadd.f32 0.5, %v686_v31  ;;  %v1364_v45 = vpop.eup %1363 }
 0x3fc   :  { %v691_v39 = vadd.f32 0.5, %v690_v35  ;;  %v695_v46 = vmul.f32 0.5, %v1364_v45 }
 0x3fd   :  { %v698_v42 = vmul.f32 %v1362_v38, %v687_v37  ;;  %v832_v38 = vpop.permute.xlu0 %831 }
 0x3fe   :  { %v697_v55 = vmul.f32 %v691_v39, %v1821_v63  ;;  %v696_v48 = vadd.f32 0.5, %v695_v46  ;;  %vm833_vm13 = vcmp.eq.s32.totalorder %v832_v38, 1  ;;  %v1420_v38 = vld [vmem:[%s2122_s2 + $0x6c] ss:$16 sps:$4 sm:$0xff]  }
 0x400   :  { %v699_v44 = vadd.f32 %v698_v42, %v697_v55 }
 0x402   :  { %1365 = vtanh.f32 %v699_v44  ;;  %v1870_v43 = vsel %vm709_vm12, %v699_v44, %v1821_v63 }
 0x40c   :  { %v1366_v49 = vpop.eup %1365 }
 0x40d   :  { %v701_v50 = vmul.f32 %v1366_v49, %v696_v48 }
 0x40f   :  { %v1873_v51 = vsel %vm709_vm12, %v701_v50, %v1824_v40  ;;  %v1929_v50 = vld [vmem:[%s2122_s2] ss:$16 sps:$4 sm:$0xff]  }
 0x410   :  { %v721_v52 = vpack.c.bf16 %v1873_v51, %v1873_v51 }
 0x412   :  { %755 = vmatmul.mubr.bf16.vlgmr.msra.gmra.mrb[16].mxu0 %v721_v52  ;;  %796 = vmatmul.mubr.bf16.vlgmr.msra.gmra.mrb[16].mxu1 %v721_v52  ;;  %v1947_v52 = vld [vmem:[%s2122_s2 + $0x2c] ss:$16 sps:$4 sm:$0xff]  }
 0x413   :  { %847 = vmatpush1.bf16.msra.mxu0 %v1477_v2  ;;  %888 = vmatpush1.bf16.msra.mxu1 %v1501_v6  ;;  %v1263_v2 = vld [vmem:[%s2124_s1 + $0x40] sm:$0xff] }
 0x414   :  { %848 = vmatprep.subr.bf16.mxu0 %v1485_v3  ;;  %889 = vmatprep.subr.bf16.mxu1 %v1513_v8  ;;  %v717_v3 = vunpack.c.l.bf16 %v1263_v2  ;;  %v718_v6 = vunpack.c.h.bf16 %v1263_v2  ;;  %v1955_v2 = vld [vmem:[%s2122_s2 + $0x20] ss:$16 sps:$4 sm:$0xff]  }
 0x415   :  { %878 = vmatprep.mubr.bf16.mxu0 %v1445_v1  ;;  %919 = vmatprep.mubr.bf16.mxu1 %v1445_v1 }
 0x417   :  { %849 = vmatpush1.bf16.msra.mxu0 %v1496_v5  ;;  %890 = vmatpush1.bf16.msra.mxu1 %v1519_v9  ;;  %v1264_v5 = vld [vmem:[%s2124_s1 + $0x48] sm:$0xff] }
 0x418   :  { %850 = vmatprep.subr.bf16.mxu0 %v1507_v7  ;;  %891 = vmatprep.subr.bf16.mxu1 %v1537_v12  ;;  %v720_v57 = vunpack.c.h.bf16 %v1264_v5 }
 0x41b   :  { %851 = vmatpush1.bf16.msra.mxu0 %v1526_v10  ;;  %892 = vmatpush1.bf16.msra.mxu1 %v1543_v13  ;;  %v719_v10 = vunpack.c.l.bf16 %v1264_v5  ;;  %v1967_v5 = vld [vmem:[%s2122_s2 + $0x44] ss:$16 sps:$4 sm:$0xff]  }
 0x41c   :  { %852 = vmatprep.subr.bf16.mxu0 %v1532_v11  ;;  %893 = vmatprep.subr.bf16.mxu1 %v1555_v15 }
 0x41f   :  { %853 = vmatpush1.bf16.msra.mxu0 %v1550_v14  ;;  %894 = vmatpush1.bf16.msra.mxu1 %v1572_v18 }
 0x420   :  { %854 = vmatprep.subr.bf16.mxu0 %v1561_v16  ;;  %895 = vmatprep.subr.bf16.mxu1 %v1579_v19 }
 0x423   :  { %855 = vmatpush1.bf16.msra.mxu0 %v1567_v17  ;;  %896 = vmatpush1.bf16.msra.mxu1 %v1591_v21 }
 0x424   :  { %856 = vmatprep.subr.bf16.mxu0 %v1585_v20  ;;  %897 = vmatprep.subr.bf16.mxu1 %v1603_v23 }
 0x427   :  { %857 = vmatpush1.bf16.msra.mxu0 %v1598_v22  ;;  %898 = vmatpush1.bf16.msra.mxu1 %v1620_v26 }
 0x428   :  { %858 = vmatprep.subr.bf16.mxu0 %v1609_v24  ;;  %899 = vmatprep.subr.bf16.mxu1 %v1634_v28 }
 0x42b   :  { %859 = vmatpush1.bf16.msra.mxu0 %v1629_v27  ;;  %900 = vmatpush1.bf16.msra.mxu1 %v1648_v32 }
 0x42c   :  { %860 = vmatprep.subr.bf16.mxu0 %v1641_v30  ;;  %901 = vmatprep.subr.bf16.mxu1 %v1661_v34 }
 0x42f   :  { %861 = vmatpush1.bf16.msra.mxu0 %v1656_v33  ;;  %902 = vmatpush1.bf16.msra.mxu1 %v1669_v36 }
 0x430   :  { %970 = vmatprep.subr.bf16.mxu0 %v1470_v0  ;;  %1011 = vmatprep.subr.bf16.mxu1 %v1491_v4 }
 0x4e5   :  { %v756_v7 = vpop.f32.mrb[16].mxu0  ;;  %v797_v8 = vpop.f32.mrb[16].mxu1 }
 0x4e6   :  { %v804_v9 = vadd.f32 %v756_v7, %v717_v3  ;;  %v758_v11 = vpop.f32.mrb[17].mxu0  ;;  %v799_v12 = vpop.f32.mrb[17].mxu1  ;;  %v806_v56 = vadd.f32 %v797_v8, %v719_v10  ;;  %v1961_v3 = vld [vmem:[%s2122_s2 + $0x28] ss:$16 sps:$4 sm:$0xff]   ;;  %v1979_v7 = vld [vmem:[%s2122_s2 + $0x40] ss:$16 sps:$4 sm:$0xff]  }
 0x4e7   :  { %v805_v13 = vadd.f32 %v758_v11, %v718_v6  ;;  %v760_v0 = vpop.f32.mrb[18].mxu0  ;;  %v801_v63 = vpop.f32.mrb[18].mxu1  ;;  %v807_v58 = vadd.f32 %v799_v12, %v720_v57  ;;  %v1973_v6 = vld [vmem:[%s2122_s2 + $0x4c] ss:$16 sps:$4 sm:$0xff]   ;;  %v1985_v8 = vld [vmem:[%s2122_s2 + $0x48] ss:$16 sps:$4 sm:$0xff]  }
 0x4e8   :  { %v808_v4 = vmul.f32 0.5, %v804_v9  ;;  %v761_v40 = vpop.f32.mrb[19].mxu0  ;;  %v802_v53 = vpop.f32.mrb[19].mxu1  ;;  %v1991_v9 = vld [vmem:[%s2122_s2 + $0x64] ss:$16 sps:$4 sm:$0xff]  }
 0x4e9   :  { %v812_v54 = vmul.f32 0.5, %v805_v13  ;;  %v817_v59 = vmul.f32 0.5, %v807_v58 }
 0x4ea   :  { %1367 = vtanh.f32 %v808_v4 }
 0x4eb   :  { %1369 = vtanh.f32 %v812_v54 }
 0x4ec   :  { %1371 = vtanh.f32 %v806_v56 }
 0x4ed   :  { %1373 = vtanh.f32 %v817_v59  ;;  %v956_v59 = vpop.permute.xlu1 %955 }
 0x4ee   :  { %vm957_vm14 = vcmp.eq.s32.totalorder %v956_v59, 1 }
 0x4f4   :  { %v1368_v60 = vpop.eup %1367 }
 0x4f5   :  { %v1370_v61 = vpop.eup %1369  ;;  %v810_v62 = vmul.f32 0.5, %v1368_v60 }
 0x4f6   :  { %v814_v41 = vmul.f32 0.5, %v1370_v61  ;;  %v1372_v29 = vpop.eup %1371 }
 0x4f7   :  { %v811_v47 = vadd.f32 0.5, %v810_v62  ;;  %v1374_v55 = vpop.eup %1373 }
 0x4f8   :  { %v815_v31 = vadd.f32 0.5, %v814_v41  ;;  %v819_v25 = vmul.f32 0.5, %v1374_v55  ;;  %v1424_v55 = vld [vmem:[%s2122_s2 + $0x8c] ss:$16 sps:$4 sm:$0xff]  }
 0x4f9   :  { %v822_v35 = vmul.f32 %v1372_v29, %v811_v47 }
 0x4fa   :  { %v821_v37 = vmul.f32 %v815_v31, %v1870_v43  ;;  %v820_v44 = vadd.f32 0.5, %v819_v25  ;;  %v1425_v25 = vld [vmem:[%s2122_s2 + $0x80] ss:$16 sps:$4 sm:$0xff]  }
 0x4fc   :  { %v823_v39 = vadd.f32 %v822_v35, %v821_v37 }
 0x4fe   :  { %1375 = vtanh.f32 %v823_v39  ;;  %v1919_v42 = vsel %vm833_vm13, %v823_v39, %v1870_v43  ;;  %v1935_v43 = vld [vmem:[%s2122_s2 + $0x8] ss:$16 sps:$4 sm:$0xff]  }
 0x4ff   :  { %v1422_v39 = vld [vmem:[%s2122_s2 + $0x68] ss:$16 sps:$4 sm:$0xff]  }
 0x508   :  { %v1376_v45 = vpop.eup %1375 }
 0x509   :  { %v825_v46 = vmul.f32 %v1376_v45, %v820_v44  ;;  %v1426_v44 = vld [vmem:[%s2122_s2 + $0x88] ss:$16 sps:$4 sm:$0xff]   ;;  %v1427_v45 = vld [vmem:[%s2122_s2 + $0xa4] ss:$16 sps:$4 sm:$0xff]  }
 0x50b   :  { %v1922_v48 = vsel %vm833_vm13, %v825_v46, %v1873_v51  ;;  %v1941_v51 = vld [vmem:[%s2122_s2 + $0x24] ss:$16 sps:$4 sm:$0xff]   ;;  %v1428_v46 = vld [vmem:[%s2122_s2 + $0xac] ss:$16 sps:$4 sm:$0xff]  }
 0x50c   :  { %v845_v49 = vpack.c.bf16 %v1922_v48, %v1922_v48 }
 0x50e   :  { %879 = vmatmul.mubr.bf16.vlgmr.msra.gmra.mrb[20].mxu0 %v845_v49  ;;  %920 = vmatmul.mubr.bf16.vlgmr.msra.gmra.mrb[20].mxu1 %v845_v49  ;;  %v1430_v49 = vld [vmem:[%s2122_s2 + $0xa8] ss:$16 sps:$4 sm:$0xff]  }
 0x50f   :  { %971 = vmatpush1.bf16.msra.mxu0 %v1929_v50  ;;  %1012 = vmatpush1.bf16.msra.mxu1 %v1935_v43 }
 0x510   :  { %972 = vmatprep.subr.bf16.mxu0 %v1941_v51  ;;  %1013 = vmatprep.subr.bf16.mxu1 %v1947_v52 }
 0x511   :  { %1002 = vmatprep.mubr.bf16.mxu0 %v1445_v1  ;;  %1043 = vmatprep.mubr.bf16.mxu1 %v1445_v1 }
 0x513   :  { %973 = vmatpush1.bf16.msra.mxu0 %v1955_v2  ;;  %1014 = vmatpush1.bf16.msra.mxu1 %v1961_v3 }
 0x514   :  { %974 = vmatprep.subr.bf16.mxu0 %v1967_v5  ;;  %1015 = vmatprep.subr.bf16.mxu1 %v1973_v6 }
 0x517   :  { %975 = vmatpush1.bf16.msra.mxu0 %v1979_v7  ;;  %1016 = vmatpush1.bf16.msra.mxu1 %v1985_v8 }
 0x518   :  { %976 = vmatprep.subr.bf16.mxu0 %v1991_v9  ;;  %1017 = vmatprep.subr.bf16.mxu1 %v1555_v15  ;;  %v1419_v15 = vld [vmem:[%s2122_s2 + $0xc] ss:$16 sps:$4 sm:$0xff]  }
 0x51b   :  { %977 = vmatpush1.bf16.msra.mxu0 %v1550_v14  ;;  %1018 = vmatpush1.bf16.msra.mxu1 %v1572_v18  ;;  %v1418_v14 = vld [vmem:[%s2122_s2 + $0x4] ss:$16 sps:$4 sm:$0xff]   ;;  %v1267_v18 = vld [vmem:[%s2124_s1 + $0x58] sm:$0xff] }
 0x51c   :  { %978 = vmatprep.subr.bf16.mxu0 %v1561_v16  ;;  %1019 = vmatprep.subr.bf16.mxu1 %v1579_v19  ;;  %v1266_v16 = vld [vmem:[%s2124_s1 + $0x50] sm:$0xff]  ;;  %v844_v11 = vunpack.c.h.bf16 %v1267_v18 }
 0x51d   :  { %v842_v19 = vunpack.c.h.bf16 %v1266_v16 }
 0x51f   :  { %979 = vmatpush1.bf16.msra.mxu0 %v1567_v17  ;;  %1020 = vmatpush1.bf16.msra.mxu1 %v1591_v21  ;;  %v841_v17 = vunpack.c.l.bf16 %v1266_v16 }
 0x520   :  { %980 = vmatprep.subr.bf16.mxu0 %v1585_v20  ;;  %1021 = vmatprep.subr.bf16.mxu1 %v1603_v23  ;;  %v843_v23 = vunpack.c.l.bf16 %v1267_v18 }
 0x523   :  { %981 = vmatpush1.bf16.msra.mxu0 %v1598_v22  ;;  %1022 = vmatpush1.bf16.msra.mxu1 %v1620_v26 }
 0x524   :  { %982 = vmatprep.subr.bf16.mxu0 %v1609_v24  ;;  %1023 = vmatprep.subr.bf16.mxu1 %v1634_v28 }
 0x527   :  { %983 = vmatpush1.bf16.msra.mxu0 %v1629_v27  ;;  %1024 = vmatpush1.bf16.msra.mxu1 %v1648_v32 }
 0x528   :  { %984 = vmatprep.subr.bf16.mxu0 %v1641_v30  ;;  %1025 = vmatprep.subr.bf16.mxu1 %v1661_v34 }
 0x52b   :  { %985 = vmatpush1.bf16.msra.mxu0 %v1656_v33  ;;  %1026 = vmatpush1.bf16.msra.mxu1 %v1669_v36 }
 0x52c   :  { %1094 = vmatprep.subr.bf16.mxu0 %v1418_v14  ;;  %1135 = vmatprep.subr.bf16.mxu1 %v1419_v15 }
 0x5e1   :  { %v880_v20 = vpop.f32.mrb[20].mxu0  ;;  %v921_v21 = vpop.f32.mrb[20].mxu1 }
 0x5e2   :  { %v928_v22 = vadd.f32 %v880_v20, %v841_v17  ;;  %v882_v24 = vpop.f32.mrb[21].mxu0  ;;  %v923_v26 = vpop.f32.mrb[21].mxu1  ;;  %v930_v10 = vadd.f32 %v921_v21, %v843_v23 }
 0x5e3   :  { %v929_v27 = vadd.f32 %v882_v24, %v842_v19  ;;  %v884_v28 = vpop.f32.mrb[22].mxu0  ;;  %v925_v30 = vpop.f32.mrb[22].mxu1  ;;  %v931_v12 = vadd.f32 %v923_v26, %v844_v11 }
 0x5e4   :  { %v932_v32 = vmul.f32 0.5, %v928_v22  ;;  %v885_v33 = vpop.f32.mrb[23].mxu0  ;;  %v926_v34 = vpop.f32.mrb[23].mxu1 }
 0x5e5   :  { %v936_v36 = vmul.f32 0.5, %v929_v27  ;;  %v941_v13 = vmul.f32 0.5, %v931_v12 }
 0x5e6   :  { %1377 = vtanh.f32 %v932_v32 }
 0x5e7   :  { %1379 = vtanh.f32 %v936_v36 }
 0x5e8   :  { %1381 = vtanh.f32 %v930_v10 }
 0x5e9   :  { %1383 = vtanh.f32 %v941_v13 }
 0x5f0   :  { %v1378_v0 = vpop.eup %1377 }
 0x5f1   :  { %v1380_v63 = vpop.eup %1379  ;;  %v934_v4 = vmul.f32 0.5, %v1378_v0 }
 0x5f2   :  { %v938_v40 = vmul.f32 0.5, %v1380_v63  ;;  %v1382_v54 = vpop.eup %1381 }
 0x5f3   :  { %v935_v53 = vadd.f32 0.5, %v934_v4  ;;  %v1384_v62 = vpop.eup %1383 }
 0x5f4   :  { %v939_v56 = vadd.f32 0.5, %v938_v40  ;;  %v943_v41 = vmul.f32 0.5, %v1384_v62  ;;  %v1080_v40 = vpop.permute.xlu0 %1079 }
 0x5f5   :  { %v946_v57 = vmul.f32 %v1382_v54, %v935_v53  ;;  %vm1081_vm15 = vcmp.eq.s32.totalorder %v1080_v40, 1 }
 0x5f6   :  { %v945_v58 = vmul.f32 %v939_v56, %v1919_v42  ;;  %v944_v47 = vadd.f32 0.5, %v943_v41 }
 0x5f8   :  { %v947_v60 = vadd.f32 %v946_v57, %v945_v58 }
 0x5fa   :  { %1385 = vtanh.f32 %v947_v60  ;;  %v2027_v61 = vsel %vm957_vm14, %v947_v60, %v1919_v42  ;;  %v1423_v42 = vld [vmem:[%s2122_s2 + $0x84] ss:$16 sps:$4 sm:$0xff]  }
 0x604   :  { %v1386_v29 = vpop.eup %1385 }
 0x605   :  { %v949_v31 = vmul.f32 %v1386_v29, %v944_v47  ;;  %v1272_v29 = vld [vmem:[%s2124_s1 + $0x70] sm:$0xff] }
 0x607   :  { %v2030_v35 = vsel %vm957_vm14, %v949_v31, %v1922_v48  ;;  %v1429_v48 = vld [vmem:[%s2122_s2 + $0xa0] ss:$16 sps:$4 sm:$0xff]   ;;  %v1089_v31 = vunpack.c.l.bf16 %v1272_v29 }
 0x608   :  { %v969_v37 = vpack.c.bf16 %v2030_v35, %v2030_v35 }
 0x60a   :  { %1003 = vmatmul.mubr.bf16.vlgmr.msra.gmra.mrb[24].mxu0 %v969_v37  ;;  %1044 = vmatmul.mubr.bf16.vlgmr.msra.gmra.mrb[24].mxu1 %v969_v37  ;;  %v1273_v37 = vld [vmem:[%s2124_s1 + $0x78] sm:$0xff] }
 0x60b   :  { %1095 = vmatpush1.bf16.msra.mxu0 %v1929_v50  ;;  %1136 = vmatpush1.bf16.msra.mxu1 %v1935_v43  ;;  %v1431_v50 = vld [vmem:[%s2122_s2 + $0xc4] ss:$16 sps:$4 sm:$0xff]   ;;  %v1432_v43 = vld [vmem:[%s2122_s2 + $0xcc] ss:$16 sps:$4 sm:$0xff]  }
 0x60c   :  { %1096 = vmatprep.subr.bf16.mxu0 %v1941_v51  ;;  %1137 = vmatprep.subr.bf16.mxu1 %v1947_v52  ;;  %v1433_v51 = vld [vmem:[%s2122_s2 + $0xc0] ss:$16 sps:$4 sm:$0xff]   ;;  %v1434_v52 = vld [vmem:[%s2122_s2 + $0xc8] ss:$16 sps:$4 sm:$0xff]  }
 0x60d   :  { %1126 = vmatprep.mubr.bf16.mxu0 %v1445_v1  ;;  %1167 = vmatprep.mubr.bf16.mxu1 %v1445_v1  ;;  %v1421_v1 = vld [vmem:[%s2122_s2 + $0x60] ss:$16 sps:$4 sm:$0xff]  }
 0x60f   :  { %1097 = vmatpush1.bf16.msra.mxu0 %v1955_v2  ;;  %1138 = vmatpush1.bf16.msra.mxu1 %v1961_v3  ;;  %v1435_v2 = vld [vmem:[%s2122_s2 + $0xe4] ss:$16 sps:$4 sm:$0xff]   ;;  %v1436_v3 = vld [vmem:[%s2122_s2 + $0xec] ss:$16 sps:$4 sm:$0xff]  }
 0x610   :  { %1098 = vmatprep.subr.bf16.mxu0 %v1967_v5  ;;  %1139 = vmatprep.subr.bf16.mxu1 %v1973_v6  ;;  %v1437_v5 = vld [vmem:[%s2122_s2 + $0xe0] ss:$16 sps:$4 sm:$0xff]   ;;  %v1438_v6 = vld [vmem:[%s2122_s2 + $0xe8] ss:$16 sps:$4 sm:$0xff]  }
 0x613   :  { %1099 = vmatpush1.bf16.msra.mxu0 %v1979_v7  ;;  %1140 = vmatpush1.bf16.msra.mxu1 %v1985_v8  ;;  %v1269_v7 = vld [vmem:[%s2124_s1 + $0x60] sm:$0xff] }
 0x614   :  { %1100 = vmatprep.subr.bf16.mxu0 %v1991_v9  ;;  %1141 = vmatprep.subr.bf16.mxu1 %v1420_v38  ;;  %v965_v8 = vunpack.c.l.bf16 %v1269_v7  ;;  %v1270_v9 = vld [vmem:[%s2124_s1 + $0x68] sm:$0xff]  ;;  %v966_v14 = vunpack.c.h.bf16 %v1269_v7 }
 0x615   :  { %v967_v18 = vunpack.c.l.bf16 %v1270_v9  ;;  %v968_v32 = vunpack.c.h.bf16 %v1270_v9 }
 0x617   :  { %1101 = vmatpush1.bf16.msra.mxu0 %v1421_v1  ;;  %1142 = vmatpush1.bf16.msra.mxu1 %v1422_v39 }
 0x618   :  { %1102 = vmatprep.subr.bf16.mxu0 %v1423_v42  ;;  %1143 = vmatprep.subr.bf16.mxu1 %v1424_v55  ;;  %v1091_v42 = vunpack.c.l.bf16 %v1273_v37 }
 0x61b   :  { %1103 = vmatpush1.bf16.msra.mxu0 %v1425_v25  ;;  %1144 = vmatpush1.bf16.msra.mxu1 %v1426_v44 }
 0x61c   :  { %1104 = vmatprep.subr.bf16.mxu0 %v1427_v45  ;;  %1145 = vmatprep.subr.bf16.mxu1 %v1428_v46 }
 0x61f   :  { %1105 = vmatpush1.bf16.msra.mxu0 %v1429_v48  ;;  %1146 = vmatpush1.bf16.msra.mxu1 %v1430_v49 }
 0x620   :  { %1106 = vmatprep.subr.bf16.mxu0 %v1431_v50  ;;  %1147 = vmatprep.subr.bf16.mxu1 %v1432_v43 }
 0x623   :  { %1107 = vmatpush1.bf16.msra.mxu0 %v1433_v51  ;;  %1148 = vmatpush1.bf16.msra.mxu1 %v1434_v52  ;;  %v1092_v51 = vunpack.c.h.bf16 %v1273_v37 }
 0x624   :  { %1108 = vmatprep.subr.bf16.mxu0 %v1435_v2  ;;  %1149 = vmatprep.subr.bf16.mxu1 %v1436_v3 }
 0x627   :  { %1109 = vmatpush1.bf16.msra.mxu0 %v1437_v5  ;;  %1150 = vmatpush1.bf16.msra.mxu1 %v1438_v6 }
 0x6dd   :  { %v1004_v15 = vpop.f32.mrb[24].mxu0  ;;  %v1045_v16 = vpop.f32.mrb[24].mxu1 }
 0x6de   :  { %v1052_v17 = vadd.f32 %v1004_v15, %v965_v8  ;;  %v1006_v19 = vpop.f32.mrb[25].mxu0  ;;  %v1047_v20 = vpop.f32.mrb[25].mxu1  ;;  %v1054_v30 = vadd.f32 %v1045_v16, %v967_v18 }
 0x6df   :  { %v1053_v21 = vadd.f32 %v1006_v19, %v966_v14  ;;  %v1008_v22 = vpop.f32.mrb[26].mxu0  ;;  %v1049_v23 = vpop.f32.mrb[26].mxu1  ;;  %v1055_v33 = vadd.f32 %v1047_v20, %v968_v32 }
 0x6e0   :  { %v1056_v24 = vmul.f32 0.5, %v1052_v17  ;;  %v1009_v26 = vpop.f32.mrb[27].mxu0  ;;  %v1050_v27 = vpop.f32.mrb[27].mxu1 }
 0x6e1   :  { %v1060_v28 = vmul.f32 0.5, %v1053_v21  ;;  %v1065_v34 = vmul.f32 0.5, %v1055_v33  ;;  %v1204_v20 = vpop.permute.xlu1 %1203 }
 0x6e2   :  { %1387 = vtanh.f32 %v1056_v24  ;;  %vm1205_vm0 = vcmp.eq.s32.totalorder %v1204_v20, 1 }
 0x6e3   :  { %1389 = vtanh.f32 %v1060_v28 }
 0x6e4   :  { %1391 = vtanh.f32 %v1054_v30 }
 0x6e5   :  { %1393 = vtanh.f32 %v1065_v34 }
 0x6ec   :  { %v1388_v36 = vpop.eup %1387 }
 0x6ed   :  { %v1390_v10 = vpop.eup %1389  ;;  %v1058_v11 = vmul.f32 0.5, %v1388_v36 }
 0x6ee   :  { %v1062_v12 = vmul.f32 0.5, %v1390_v10  ;;  %v1392_v0 = vpop.eup %1391 }
 0x6ef   :  { %v1059_v13 = vadd.f32 0.5, %v1058_v11  ;;  %v1394_v57 = vpop.eup %1393 }
 0x6f0   :  { %v1063_v63 = vadd.f32 0.5, %v1062_v12  ;;  %v1067_v58 = vmul.f32 0.5, %v1394_v57 }
 0x6f1   :  { %v1070_v4 = vmul.f32 %v1392_v0, %v1059_v13 }
 0x6f2   :  { %v1069_v53 = vmul.f32 %v1063_v63, %v2027_v61  ;;  %v1068_v59 = vadd.f32 0.5, %v1067_v58 }
 0x6f4   :  { %v1071_v54 = vadd.f32 %v1070_v4, %v1069_v53 }
 0x6f6   :  { %1395 = vtanh.f32 %v1071_v54  ;;  %v1083_v56 = vsel %vm1081_vm15, %v1071_v54, %v2027_v61  ;;  %v1090_v61 = vunpack.c.h.bf16 %v1272_v29 }
 0x700   :  { %v1396_v60 = vpop.eup %1395 }
 0x701   :  { %v1073_v62 = vmul.f32 %v1396_v60, %v1068_v59 }
 0x703   :  { %v1082_v41 = vsel %vm1081_vm15, %v1073_v62, %v2030_v35 }
 0x704   :  { %v1093_v47 = vpack.c.bf16 %v1082_v41, %v1082_v41 }
 0x706   :  { %1127 = vmatmul.mubr.bf16.vlgmr.msra.gmra.mrb[28].mxu0 %v1093_v47  ;;  %1168 = vmatmul.mubr.bf16.vlgmr.msra.gmra.mrb[28].mxu1 %v1093_v47 }
 0x7d9   :  { %v1128_v38 = vpop.f32.mrb[28].mxu0  ;;  %v1169_v1 = vpop.f32.mrb[28].mxu1 }
 0x7da   :  { %v1176_v39 = vadd.f32 %v1128_v38, %v1089_v31  ;;  %v1130_v55 = vpop.f32.mrb[29].mxu0  ;;  %v1171_v25 = vpop.f32.mrb[29].mxu1  ;;  %v1178_v43 = vadd.f32 %v1169_v1, %v1091_v42 }
 0x7db   :  { %v1177_v35 = vadd.f32 %v1130_v55, %v1090_v61  ;;  %v1132_v44 = vpop.f32.mrb[30].mxu0  ;;  %v1173_v45 = vpop.f32.mrb[30].mxu1  ;;  %v1179_v52 = vadd.f32 %v1171_v25, %v1092_v51 }
 0x7dc   :  { %v1180_v46 = vmul.f32 0.5, %v1176_v39  ;;  %v1133_v48 = vpop.f32.mrb[31].mxu0  ;;  %v1174_v49 = vpop.f32.mrb[31].mxu1 }
 0x7dd   :  { %v1184_v50 = vmul.f32 0.5, %v1177_v35  ;;  %v1189_v2 = vmul.f32 0.5, %v1179_v52 }
 0x7de   :  { %1397 = vtanh.f32 %v1180_v46 }
 0x7df   :  { %1399 = vtanh.f32 %v1184_v50 }
 0x7e0   :  { %1401 = vtanh.f32 %v1178_v43 }
 0x7e1   :  { %1403 = vtanh.f32 %v1189_v2 }
 0x7e8   :  { %v1398_v3 = vpop.eup %1397 }
 0x7e9   :  { %v1400_v5 = vpop.eup %1399  ;;  %v1182_v6 = vmul.f32 0.5, %v1398_v3 }
 0x7ea   :  { %v1186_v7 = vmul.f32 0.5, %v1400_v5  ;;  %v1402_v9 = vpop.eup %1401 }
 0x7eb   :  { %v1183_v8 = vadd.f32 0.5, %v1182_v6  ;;  %v1404_v18 = vpop.eup %1403 }
 0x7ec   :  { %v1187_v14 = vadd.f32 0.5, %v1186_v7  ;;  %v1191_v19 = vmul.f32 0.5, %v1404_v18 }
 0x7ed   :  { %v1194_v15 = vmul.f32 %v1402_v9, %v1183_v8 }
 0x7ee   :  { %v1193_v16 = vmul.f32 %v1187_v14, %v1083_v56  ;;  %v1192_v21 = vadd.f32 0.5, %v1191_v19 }
 0x7f0   :  { %v1195_v17 = vadd.f32 %v1194_v15, %v1193_v16 }
 0x7f2   :  { %1405 = vtanh.f32 %v1195_v17 }
 0x7fc   :  { %v1406_v22 = vpop.eup %1405 }
 0x7fd   :  { %v1197_v23 = vmul.f32 %v1406_v22, %v1192_v21 }
 0x7ff   :  { %v1206_v24 = vsel %vm1205_vm0, %v1197_v23, %v1082_v41 }
 0x800   :  { %1208 = vst [vmem:[%s2125_s3] sm:$0xff] %v1206_v24 }

</bundles_post_ra>
